<compile_context>
chip_gen: v5e
topology: v5e:2x2
jax: 0.10.0
libtpu: 0.0.40
codegen_flags: <defaults>
</compile_context>

<pallas_src>
import functools

import jax
import jax.numpy as jnp
from jax import lax
from jax.experimental import pallas as pl
from jax.experimental.pallas import tpu as pltpu

_LANE = 128
_OFF = 128      # lane-aligned left margin (holds conv padding / reflect halo)
_SLACK = 128    # lane-aligned right margin
_MAX_WV = 8192  # single-time-tile cap; TODO(synk): halo time-tiling beyond this


def _round_up(v, m):
    return (v + m - 1) // m * m


# ----------------------------------------------------------------------------
# Fused kernel: every layer of one NLayerDiscriminator for one batch element.
# ----------------------------------------------------------------------------
def _fused_disc_kernel(*refs, cfg, T, Wv, W):
    """refs = (x, w_0..w_{L-1}, b_0..b_{L-1}, o_0..o_{L-1}).

    x   : (1, Cin0, W) bf16 -- true signal at lanes [_OFF, _OFF+T); layer-0
          reflection halo at [_OFF-pad0, _OFF+T+pad0); zeros elsewhere.
    w_l : (K_l, Cout_l, Cin_l) bf16 dense (de-grouped) per-tap weights.
    b_l : (Cout_l, 1) f32 bias.
    o_l : (1, Cout_l, Wv) f32 output; lanes [0, T) are valid.
    cfg : tuple of (K, pad, act, cout, cin) per layer (static).
    """
    L = len(cfg)
    x_ref = refs[0]
    w_refs = refs[1:1 + L]
    b_refs = refs[1 + L:1 + 2 * L]
    o_refs = refs[1 + 2 * L:1 + 3 * L]

    cur = x_ref[0]                                    # (Cin0, W) bf16
    for l, (K, pad, act, cout, cin) in enumerate(cfg):
        s = _OFF - pad
        acc = jnp.zeros((cout, Wv), jnp.float32)
        for k in range(K):                            # K accumulating matmuls
            xs = cur[:, s + k:s + k + Wv]             # (cin, Wv) bf16
            wk = w_refs[l][k]                         # (cout, cin) bf16
            if cin == 1:
                # contraction-1 "matmul" -> broadcast multiply-accumulate (VPU)
                acc = acc + wk.astype(jnp.float32) * xs.astype(jnp.float32)
            else:
                acc = acc + jnp.dot(wk, xs, preferred_element_type=jnp.float32)
        acc = acc + b_refs[l][...]                    # f32 bias epilogue
        if act:
            acc = jnp.where(acc >= 0.0, acc, jnp.float32(0.2) * acc)
        o_refs[l][0] = acc
        if l + 1 < L:
            y = acc
            if T < Wv:                                # kill the garbage tail
                lane = lax.broadcasted_iota(jnp.int32, (cout, Wv), 1)
                y = jnp.where(lane < T, y, 0.0)
            # re-pad for the next layer: lane-aligned zero margins act as the
            # conv's zero padding.
            cur = jnp.concatenate(
                [jnp.zeros((cout, _OFF), jnp.bfloat16),
                 y.astype(jnp.bfloat16),
                 jnp.zeros((cout, W - _OFF - Wv), jnp.bfloat16)], axis=1)


def fused_nlayer_forward(layers, x, feat):
    """NLayerDiscriminator.forward -- one pallas_call runs every layer."""
    del feat  # TODO(synk): conditioning_channels == 0, feat unused (as in ref).
    B, cin0, T = x.shape
    cfg = tuple(p["cfg"] for p in layers)
    assert cfg[0][4] == cin0
    for a, b in zip(cfg[:-1], cfg[1:]):
        assert a[3] == b[4], "channel chaining mismatch"
    pad0 = cfg[0][1]
    assert T > pad0, "reflection padding needs T > pad"
    assert max(c[1] for c in cfg) <= _OFF

    Wv = _round_up(T, _LANE)
    assert Wv <= _MAX_WV
    W = _OFF + Wv + _SLACK

    # Layer-0 reflection padding + placement (single channel -> negligible);
    # all deeper-layer padding/casting happens inside the kernel.
    xr = jnp.pad(x, ((0, 0), (0, 0), (pad0, pad0)), mode="reflect")
    xin = jnp.pad(xr, ((0, 0), (0, 0), (_OFF - pad0, W - (_OFF + T + pad0))))
    xin = xin.astype(jnp.bfloat16)

    ws = [p["w"] for p in layers]
    bs = [p["b"] for p in layers]
    kern = functools.partial(_fused_disc_kernel, cfg=cfg, T=T, Wv=Wv, W=W)

    in_specs = ([pl.BlockSpec((1, cin0, W), lambda b: (b, 0, 0))]
                + [pl.BlockSpec(w.shape, lambda b: (0, 0, 0)) for w in ws]
                + [pl.BlockSpec(bb.shape, lambda b: (0, 0)) for bb in bs])
    out_specs = [pl.BlockSpec((1, c[3], Wv), lambda b: (b, 0, 0)) for c in cfg]
    out_shape = [jax.ShapeDtypeStruct((B, c[3], Wv), jnp.float32) for c in cfg]

    outs = pl.pallas_call(
        kern,
        grid=(B,),
        in_specs=in_specs,
        out_specs=out_specs,
        out_shape=out_shape,
        compiler_params=pltpu.CompilerParams(
            dimension_semantics=("parallel",),
            vmem_limit_bytes=32 * 1024 * 1024),
    )(xin, *ws, *bs)

    return [o[:, :, :T] for o in outs]


# ----------------------------------------------------------------------------
# AvgPool1d(4, stride=2, padding=1, count_include_pad=False) -- jnp glue.
# (single-channel signal between discriminators; a kernel would be overhead)
# ----------------------------------------------------------------------------
def avg_pool1d_4_2_1(x):
    B, C, T = x.shape
    xp = jnp.pad(x, ((0, 0), (0, 0), (1, 1)))
    Tout = (T + 2 - 4) // 2 + 1
    sums = (xp[:, :, 0:T - 1] + xp[:, :, 1:T]
            + xp[:, :, 2:T + 1] + xp[:, :, 3:T + 2])
    sums = sums[:, :, ::2][:, :, :Tout]
    t = jnp.arange(Tout)
    lo = jnp.maximum(2 * t - 1, 0)
    hi = jnp.minimum(2 * t + 2, T - 1)
    counts = (hi - lo + 1).astype(jnp.float32)        # count_include_pad=False
    return sums / counts[None, None, :]


# ----------------------------------------------------------------------------
# Deterministic weight-norm Conv1d params + one-time kernel-layout preparation
# ----------------------------------------------------------------------------
def init_wn_conv1d(key, cin, cout, K, groups=1):
    cpg = cin // groups
    kv, kg, kb = jax.random.split(key, 3)
    v = jax.random.uniform(kv, (cout, cpg, K), jnp.float32, minval=-0.1, maxval=0.1)
    g = jax.random.uniform(kg, (cout,), jnp.float32, minval=0.5, maxval=1.5)
    norm = jnp.sqrt(jnp.sum(v * v, axis=(1, 2), keepdims=True))
    w = g[:, None, None] * v / norm                   # weight_norm(dim=0)
    b = jax.random.uniform(kb, (cout,), jnp.float32, minval=-0.1, maxval=0.1)
    return w, b


def _prep_layer(w, b, *, cin, cout, K, pad, groups, act):
    """Pre-compute kernel-ready weights once (outside the per-forward path)."""
    assert 2 * pad == K - 1, "fused kernel assumes 'same'-length convs"
    cpg, opg = cin // groups, cout // groups
    # Densify the block-diagonal grouped weight (tiny at these channel counts).
    # TODO(synk): restore a per-group path for large-channel configs where the
    # densified weight would not be negligible.
    dense = jnp.zeros((cout, cin, K), jnp.float32)
    wg = w.reshape(groups, opg, cpg, K)
    for g in range(groups):
        dense = dense.at[g * opg:(g + 1) * opg, g * cpg:(g + 1) * cpg, :].set(wg[g])
    wt = jnp.transpose(dense, (2, 0, 1)).astype(jnp.bfloat16)   # (K, Cout, Cin)
    return dict(w=wt, b=b.reshape(cout, 1).astype(jnp.float32),
                cfg=(K, pad, act, cout, cin))


def build_nlayer_disc(key, ndf, n_layers, downsampling_factor):
    """Params mirroring NLayerDiscriminator.__init__ (conditioning_channels=0)."""
    stride = downsampling_factor
    assert stride == 1  # TODO(synk): stride > 1 needs a phase-decomposed kernel
    keys = jax.random.split(key, n_layers + 3)
    layers = []
    # layer_0: ReflectionPad1d(7) + Conv1d(1, ndf, 15) + LeakyReLU(0.2)
    w, b = init_wn_conv1d(keys[0], 1, ndf, 15, groups=1)
    layers.append(_prep_layer(w, b, cin=1, cout=ndf, K=15, pad=7, groups=1, act=True))
    nf = ndf
    nf_prev = nf
    for n in range(1, n_layers + 1):
        nf_prev = nf
        nf = min(nf * stride, 1024)
        groups = nf_prev // 4
        K = stride * 10 + 1
        w, b = init_wn_conv1d(keys[n], nf_prev, nf, K, groups=groups)
        layers.append(_prep_layer(w, b, cin=nf_prev, cout=nf, K=K, pad=stride * 5,
                                  groups=groups, act=True))
    # layer_{n_layers+1}: Conv1d(nf_prev, min(nf*2,1024), 5, 1, 2) + LeakyReLU
    nf = min(nf * 2, 1024)
    w, b = init_wn_conv1d(keys[n_layers + 1], nf_prev, nf, 5, groups=1)
    layers.append(_prep_layer(w, b, cin=nf_prev, cout=nf, K=5, pad=2, groups=1, act=True))
    # layer_{n_layers+2}: Conv1d(nf, 1, 3, 1, 1)   (no activation)
    w, b = init_wn_conv1d(keys[n_layers + 2], nf, 1, 3, groups=1)
    layers.append(_prep_layer(w, b, cin=nf, cout=1, K=3, pad=1, groups=1, act=False))
    return layers


# ----------------------------------------------------------------------------
# Forward passes
# ----------------------------------------------------------------------------
def discriminator_forward(all_disc_params, x, feat):
    features = []
    judgements = []
    for layers in all_disc_params:
        z = fused_nlayer_forward(layers, x, feat)
        features.append(z[:-1])
        judgements.append(z[-1])
        x = avg_pool1d_4_2_1(x)
    return features, judgements


# ----------------------------------------------------------------------------
if __name__ == "__main__":
    # Discriminator(num_D=2, ndf=8, n_layers=2, downsampling_factor=1,
    #               conditioning_channels=0) at small shapes.
    num_D, ndf, n_layers, downsampling_factor = 2, 8, 2, 1
    B, T = 2, 64

    key = jax.random.PRNGKey(0)
    kx, kf, kp = jax.random.split(key, 3)
    x = jax.random.normal(kx, (B, 1, T), jnp.float32)      # mono audio, NCT
    feat = jax.random.normal(kf, (B, 4, T), jnp.float32)   # unused (cond=0)

    disc_keys = jax.random.split(kp, num_D)
    all_params = [build_nlayer_disc(k, ndf, n_layers, downsampling_factor)
                  for k in disc_keys]

    features, judgements = discriminator_forward(all_params, x, feat)

    for f_list in features:
        for f in f_list:
            jax.block_until_ready(f)
    for j in judgements:
        jax.block_until_ready(j)

    print("KERNEL_OK")
</pallas_src>

<mosaic_0001>
module attributes {stable_mosaic.version = 11 : i64} {
  func.func @_fused_disc_kernel(%arg0: i32, %arg1: memref<1x1x384xbf16, #tpu.memory_space<vmem>>, %arg2: memref<15x8x1xbf16, #tpu.memory_space<vmem>>, %arg3: memref<11x8x8xbf16, #tpu.memory_space<vmem>>, %arg4: memref<11x8x8xbf16, #tpu.memory_space<vmem>>, %arg5: memref<5x16x8xbf16, #tpu.memory_space<vmem>>, %arg6: memref<3x1x16xbf16, #tpu.memory_space<vmem>>, %arg7: memref<8x1xf32, #tpu.memory_space<vmem>>, %arg8: memref<8x1xf32, #tpu.memory_space<vmem>>, %arg9: memref<8x1xf32, #tpu.memory_space<vmem>>, %arg10: memref<16x1xf32, #tpu.memory_space<vmem>>, %arg11: memref<1x1xf32, #tpu.memory_space<vmem>>, %arg12: memref<1x8x128xf32, #tpu.memory_space<vmem>>, %arg13: memref<1x8x128xf32, #tpu.memory_space<vmem>>, %arg14: memref<1x8x128xf32, #tpu.memory_space<vmem>>, %arg15: memref<1x16x128xf32, #tpu.memory_space<vmem>>, %arg16: memref<1x1x128xf32, #tpu.memory_space<vmem>>) attributes {dimension_semantics = [#tpu.dimension_semantics<parallel>], iteration_bounds = array<i64: 2>, scalar_prefetch = 0 : i64, scratch_operands = 0 : i64, tpu.core_type = #tpu.core_type<tc>, window_params = [{transform_indices = @transform_0, window_bounds = array<i64: 1, 1, 384>}, {pipeline_mode = #tpu.pipeline_mode<synchronous>, transform_indices = @transform_1, window_bounds = array<i64: 15, 8, 1>}, {pipeline_mode = #tpu.pipeline_mode<synchronous>, transform_indices = @transform_2, window_bounds = array<i64: 11, 8, 8>}, {pipeline_mode = #tpu.pipeline_mode<synchronous>, transform_indices = @transform_3, window_bounds = array<i64: 11, 8, 8>}, {pipeline_mode = #tpu.pipeline_mode<synchronous>, transform_indices = @transform_4, window_bounds = array<i64: 5, 16, 8>}, {pipeline_mode = #tpu.pipeline_mode<synchronous>, transform_indices = @transform_5, window_bounds = array<i64: 3, 1, 16>}, {pipeline_mode = #tpu.pipeline_mode<synchronous>, transform_indices = @transform_6, window_bounds = array<i64: 8, 1>}, {pipeline_mode = #tpu.pipeline_mode<synchronous>, transform_indices = @transform_7, window_bounds = array<i64: 8, 1>}, {pipeline_mode = #tpu.pipeline_mode<synchronous>, transform_indices = @transform_8, window_bounds = array<i64: 8, 1>}, {pipeline_mode = #tpu.pipeline_mode<synchronous>, transform_indices = @transform_9, window_bounds = array<i64: 16, 1>}, {pipeline_mode = #tpu.pipeline_mode<synchronous>, transform_indices = @transform_10, window_bounds = array<i64: 1, 1>}, {transform_indices = @transform_11, window_bounds = array<i64: 1, 8, 128>}, {transform_indices = @transform_12, window_bounds = array<i64: 1, 8, 128>}, {transform_indices = @transform_13, window_bounds = array<i64: 1, 8, 128>}, {transform_indices = @transform_14, window_bounds = array<i64: 1, 16, 128>}, {transform_indices = @transform_15, window_bounds = array<i64: 1, 1, 128>}]} {
    %c0 = arith.constant 0 : index
    %c0_0 = arith.constant 0 : index
    %c0_1 = arith.constant 0 : index
    %0 = vector.load %arg1[%c0, %c0_0, %c0_1] : memref<1x1x384xbf16, #tpu.memory_space<vmem>>, vector<1x1x384xbf16>
    %1 = vector.shape_cast %0 : vector<1x1x384xbf16> to vector<1x384xbf16>
    %cst = arith.constant 0.000000e+00 : f32
    %2 = vector.broadcast %cst : f32 to vector<8x128xf32>
    %3 = vector.extract_strided_slice %1 {offsets = [0, 121], sizes = [1, 128], strides = [1, 1]} : vector<1x384xbf16> to vector<1x128xbf16>
    %c0_2 = arith.constant 0 : index
    %c0_3 = arith.constant 0 : index
    %c0_4 = arith.constant 0 : index
    %4 = vector.load %arg2[%c0_2, %c0_3, %c0_4] : memref<15x8x1xbf16, #tpu.memory_space<vmem>>, vector<1x8x1xbf16>
    %5 = vector.shape_cast %4 : vector<1x8x1xbf16> to vector<8x1xbf16>
    %6 = arith.extf %5 : vector<8x1xbf16> to vector<8x1xf32>
    %7 = arith.extf %3 : vector<1x128xbf16> to vector<1x128xf32>
    %8 = vector.broadcast %6 : vector<8x1xf32> to vector<8x128xf32>
    %9 = vector.broadcast %7 : vector<1x128xf32> to vector<8x128xf32>
    %10 = arith.mulf %8, %9 : vector<8x128xf32>
    %11 = arith.addf %2, %10 : vector<8x128xf32>
    %12 = vector.extract_strided_slice %1 {offsets = [0, 122], sizes = [1, 128], strides = [1, 1]} : vector<1x384xbf16> to vector<1x128xbf16>
    %c1 = arith.constant 1 : index
    %c0_5 = arith.constant 0 : index
    %c0_6 = arith.constant 0 : index
    %13 = vector.load %arg2[%c1, %c0_5, %c0_6] : memref<15x8x1xbf16, #tpu.memory_space<vmem>>, vector<1x8x1xbf16>
    %14 = vector.shape_cast %13 : vector<1x8x1xbf16> to vector<8x1xbf16>
    %15 = arith.extf %14 : vector<8x1xbf16> to vector<8x1xf32>
    %16 = arith.extf %12 : vector<1x128xbf16> to vector<1x128xf32>
    %17 = vector.broadcast %15 : vector<8x1xf32> to vector<8x128xf32>
    %18 = vector.broadcast %16 : vector<1x128xf32> to vector<8x128xf32>
    %19 = arith.mulf %17, %18 : vector<8x128xf32>
    %20 = arith.addf %11, %19 : vector<8x128xf32>
    %21 = vector.extract_strided_slice %1 {offsets = [0, 123], sizes = [1, 128], strides = [1, 1]} : vector<1x384xbf16> to vector<1x128xbf16>
    %c2 = arith.constant 2 : index
    %c0_7 = arith.constant 0 : index
    %c0_8 = arith.constant 0 : index
    %22 = vector.load %arg2[%c2, %c0_7, %c0_8] : memref<15x8x1xbf16, #tpu.memory_space<vmem>>, vector<1x8x1xbf16>
    %23 = vector.shape_cast %22 : vector<1x8x1xbf16> to vector<8x1xbf16>
    %24 = arith.extf %23 : vector<8x1xbf16> to vector<8x1xf32>
    %25 = arith.extf %21 : vector<1x128xbf16> to vector<1x128xf32>
    %26 = vector.broadcast %24 : vector<8x1xf32> to vector<8x128xf32>
    %27 = vector.broadcast %25 : vector<1x128xf32> to vector<8x128xf32>
    %28 = arith.mulf %26, %27 : vector<8x128xf32>
    %29 = arith.addf %20, %28 : vector<8x128xf32>
    %30 = vector.extract_strided_slice %1 {offsets = [0, 124], sizes = [1, 128], strides = [1, 1]} : vector<1x384xbf16> to vector<1x128xbf16>
    %c3 = arith.constant 3 : index
    %c0_9 = arith.constant 0 : index
    %c0_10 = arith.constant 0 : index
    %31 = vector.load %arg2[%c3, %c0_9, %c0_10] : memref<15x8x1xbf16, #tpu.memory_space<vmem>>, vector<1x8x1xbf16>
    %32 = vector.shape_cast %31 : vector<1x8x1xbf16> to vector<8x1xbf16>
    %33 = arith.extf %32 : vector<8x1xbf16> to vector<8x1xf32>
    %34 = arith.extf %30 : vector<1x128xbf16> to vector<1x128xf32>
    %35 = vector.broadcast %33 : vector<8x1xf32> to vector<8x128xf32>
    %36 = vector.broadcast %34 : vector<1x128xf32> to vector<8x128xf32>
    %37 = arith.mulf %35, %36 : vector<8x128xf32>
    %38 = arith.addf %29, %37 : vector<8x128xf32>
    %39 = vector.extract_strided_slice %1 {offsets = [0, 125], sizes = [1, 128], strides = [1, 1]} : vector<1x384xbf16> to vector<1x128xbf16>
    %c4 = arith.constant 4 : index
    %c0_11 = arith.constant 0 : index
    %c0_12 = arith.constant 0 : index
    %40 = vector.load %arg2[%c4, %c0_11, %c0_12] : memref<15x8x1xbf16, #tpu.memory_space<vmem>>, vector<1x8x1xbf16>
    %41 = vector.shape_cast %40 : vector<1x8x1xbf16> to vector<8x1xbf16>
    %42 = arith.extf %41 : vector<8x1xbf16> to vector<8x1xf32>
    %43 = arith.extf %39 : vector<1x128xbf16> to vector<1x128xf32>
    %44 = vector.broadcast %42 : vector<8x1xf32> to vector<8x128xf32>
    %45 = vector.broadcast %43 : vector<1x128xf32> to vector<8x128xf32>
    %46 = arith.mulf %44, %45 : vector<8x128xf32>
    %47 = arith.addf %38, %46 : vector<8x128xf32>
    %48 = vector.extract_strided_slice %1 {offsets = [0, 126], sizes = [1, 128], strides = [1, 1]} : vector<1x384xbf16> to vector<1x128xbf16>
    %c5 = arith.constant 5 : index
    %c0_13 = arith.constant 0 : index
    %c0_14 = arith.constant 0 : index
    %49 = vector.load %arg2[%c5, %c0_13, %c0_14] : memref<15x8x1xbf16, #tpu.memory_space<vmem>>, vector<1x8x1xbf16>
    %50 = vector.shape_cast %49 : vector<1x8x1xbf16> to vector<8x1xbf16>
    %51 = arith.extf %50 : vector<8x1xbf16> to vector<8x1xf32>
    %52 = arith.extf %48 : vector<1x128xbf16> to vector<1x128xf32>
    %53 = vector.broadcast %51 : vector<8x1xf32> to vector<8x128xf32>
    %54 = vector.broadcast %52 : vector<1x128xf32> to vector<8x128xf32>
    %55 = arith.mulf %53, %54 : vector<8x128xf32>
    %56 = arith.addf %47, %55 : vector<8x128xf32>
    %57 = vector.extract_strided_slice %1 {offsets = [0, 127], sizes = [1, 128], strides = [1, 1]} : vector<1x384xbf16> to vector<1x128xbf16>
    %c6 = arith.constant 6 : index
    %c0_15 = arith.constant 0 : index
    %c0_16 = arith.constant 0 : index
    %58 = vector.load %arg2[%c6, %c0_15, %c0_16] : memref<15x8x1xbf16, #tpu.memory_space<vmem>>, vector<1x8x1xbf16>
    %59 = vector.shape_cast %58 : vector<1x8x1xbf16> to vector<8x1xbf16>
    %60 = arith.extf %59 : vector<8x1xbf16> to vector<8x1xf32>
    %61 = arith.extf %57 : vector<1x128xbf16> to vector<1x128xf32>
    %62 = vector.broadcast %60 : vector<8x1xf32> to vector<8x128xf32>
    %63 = vector.broadcast %61 : vector<1x128xf32> to vector<8x128xf32>
    %64 = arith.mulf %62, %63 : vector<8x128xf32>
    %65 = arith.addf %56, %64 : vector<8x128xf32>
    %66 = vector.extract_strided_slice %1 {offsets = [0, 128], sizes = [1, 128], strides = [1, 1]} : vector<1x384xbf16> to vector<1x128xbf16>
    %c7 = arith.constant 7 : index
    %c0_17 = arith.constant 0 : index
    %c0_18 = arith.constant 0 : index
    %67 = vector.load %arg2[%c7, %c0_17, %c0_18] : memref<15x8x1xbf16, #tpu.memory_space<vmem>>, vector<1x8x1xbf16>
    %68 = vector.shape_cast %67 : vector<1x8x1xbf16> to vector<8x1xbf16>
    %69 = arith.extf %68 : vector<8x1xbf16> to vector<8x1xf32>
    %70 = arith.extf %66 : vector<1x128xbf16> to vector<1x128xf32>
    %71 = vector.broadcast %69 : vector<8x1xf32> to vector<8x128xf32>
    %72 = vector.broadcast %70 : vector<1x128xf32> to vector<8x128xf32>
    %73 = arith.mulf %71, %72 : vector<8x128xf32>
    %74 = arith.addf %65, %73 : vector<8x128xf32>
    %75 = vector.extract_strided_slice %1 {offsets = [0, 129], sizes = [1, 128], strides = [1, 1]} : vector<1x384xbf16> to vector<1x128xbf16>
    %c8 = arith.constant 8 : index
    %c0_19 = arith.constant 0 : index
    %c0_20 = arith.constant 0 : index
    %76 = vector.load %arg2[%c8, %c0_19, %c0_20] : memref<15x8x1xbf16, #tpu.memory_space<vmem>>, vector<1x8x1xbf16>
    %77 = vector.shape_cast %76 : vector<1x8x1xbf16> to vector<8x1xbf16>
    %78 = arith.extf %77 : vector<8x1xbf16> to vector<8x1xf32>
    %79 = arith.extf %75 : vector<1x128xbf16> to vector<1x128xf32>
    %80 = vector.broadcast %78 : vector<8x1xf32> to vector<8x128xf32>
    %81 = vector.broadcast %79 : vector<1x128xf32> to vector<8x128xf32>
    %82 = arith.mulf %80, %81 : vector<8x128xf32>
    %83 = arith.addf %74, %82 : vector<8x128xf32>
    %84 = vector.extract_strided_slice %1 {offsets = [0, 130], sizes = [1, 128], strides = [1, 1]} : vector<1x384xbf16> to vector<1x128xbf16>
    %c9 = arith.constant 9 : index
    %c0_21 = arith.constant 0 : index
    %c0_22 = arith.constant 0 : index
    %85 = vector.load %arg2[%c9, %c0_21, %c0_22] : memref<15x8x1xbf16, #tpu.memory_space<vmem>>, vector<1x8x1xbf16>
    %86 = vector.shape_cast %85 : vector<1x8x1xbf16> to vector<8x1xbf16>
    %87 = arith.extf %86 : vector<8x1xbf16> to vector<8x1xf32>
    %88 = arith.extf %84 : vector<1x128xbf16> to vector<1x128xf32>
    %89 = vector.broadcast %87 : vector<8x1xf32> to vector<8x128xf32>
    %90 = vector.broadcast %88 : vector<1x128xf32> to vector<8x128xf32>
    %91 = arith.mulf %89, %90 : vector<8x128xf32>
    %92 = arith.addf %83, %91 : vector<8x128xf32>
    %93 = vector.extract_strided_slice %1 {offsets = [0, 131], sizes = [1, 128], strides = [1, 1]} : vector<1x384xbf16> to vector<1x128xbf16>
    %c10 = arith.constant 10 : index
    %c0_23 = arith.constant 0 : index
    %c0_24 = arith.constant 0 : index
    %94 = vector.load %arg2[%c10, %c0_23, %c0_24] : memref<15x8x1xbf16, #tpu.memory_space<vmem>>, vector<1x8x1xbf16>
    %95 = vector.shape_cast %94 : vector<1x8x1xbf16> to vector<8x1xbf16>
    %96 = arith.extf %95 : vector<8x1xbf16> to vector<8x1xf32>
    %97 = arith.extf %93 : vector<1x128xbf16> to vector<1x128xf32>
    %98 = vector.broadcast %96 : vector<8x1xf32> to vector<8x128xf32>
    %99 = vector.broadcast %97 : vector<1x128xf32> to vector<8x128xf32>
    %100 = arith.mulf %98, %99 : vector<8x128xf32>
    %101 = arith.addf %92, %100 : vector<8x128xf32>
    %102 = vector.extract_strided_slice %1 {offsets = [0, 132], sizes = [1, 128], strides = [1, 1]} : vector<1x384xbf16> to vector<1x128xbf16>
    %c11 = arith.constant 11 : index
    %c0_25 = arith.constant 0 : index
    %c0_26 = arith.constant 0 : index
    %103 = vector.load %arg2[%c11, %c0_25, %c0_26] : memref<15x8x1xbf16, #tpu.memory_space<vmem>>, vector<1x8x1xbf16>
    %104 = vector.shape_cast %103 : vector<1x8x1xbf16> to vector<8x1xbf16>
    %105 = arith.extf %104 : vector<8x1xbf16> to vector<8x1xf32>
    %106 = arith.extf %102 : vector<1x128xbf16> to vector<1x128xf32>
    %107 = vector.broadcast %105 : vector<8x1xf32> to vector<8x128xf32>
    %108 = vector.broadcast %106 : vector<1x128xf32> to vector<8x128xf32>
    %109 = arith.mulf %107, %108 : vector<8x128xf32>
    %110 = arith.addf %101, %109 : vector<8x128xf32>
    %111 = vector.extract_strided_slice %1 {offsets = [0, 133], sizes = [1, 128], strides = [1, 1]} : vector<1x384xbf16> to vector<1x128xbf16>
    %c12 = arith.constant 12 : index
    %c0_27 = arith.constant 0 : index
    %c0_28 = arith.constant 0 : index
    %112 = vector.load %arg2[%c12, %c0_27, %c0_28] : memref<15x8x1xbf16, #tpu.memory_space<vmem>>, vector<1x8x1xbf16>
    %113 = vector.shape_cast %112 : vector<1x8x1xbf16> to vector<8x1xbf16>
    %114 = arith.extf %113 : vector<8x1xbf16> to vector<8x1xf32>
    %115 = arith.extf %111 : vector<1x128xbf16> to vector<1x128xf32>
    %116 = vector.broadcast %114 : vector<8x1xf32> to vector<8x128xf32>
    %117 = vector.broadcast %115 : vector<1x128xf32> to vector<8x128xf32>
    %118 = arith.mulf %116, %117 : vector<8x128xf32>
    %119 = arith.addf %110, %118 : vector<8x128xf32>
    %120 = vector.extract_strided_slice %1 {offsets = [0, 134], sizes = [1, 128], strides = [1, 1]} : vector<1x384xbf16> to vector<1x128xbf16>
    %c13 = arith.constant 13 : index
    %c0_29 = arith.constant 0 : index
    %c0_30 = arith.constant 0 : index
    %121 = vector.load %arg2[%c13, %c0_29, %c0_30] : memref<15x8x1xbf16, #tpu.memory_space<vmem>>, vector<1x8x1xbf16>
    %122 = vector.shape_cast %121 : vector<1x8x1xbf16> to vector<8x1xbf16>
    %123 = arith.extf %122 : vector<8x1xbf16> to vector<8x1xf32>
    %124 = arith.extf %120 : vector<1x128xbf16> to vector<1x128xf32>
    %125 = vector.broadcast %123 : vector<8x1xf32> to vector<8x128xf32>
    %126 = vector.broadcast %124 : vector<1x128xf32> to vector<8x128xf32>
    %127 = arith.mulf %125, %126 : vector<8x128xf32>
    %128 = arith.addf %119, %127 : vector<8x128xf32>
    %129 = vector.extract_strided_slice %1 {offsets = [0, 135], sizes = [1, 128], strides = [1, 1]} : vector<1x384xbf16> to vector<1x128xbf16>
    %c14 = arith.constant 14 : index
    %c0_31 = arith.constant 0 : index
    %c0_32 = arith.constant 0 : index
    %130 = vector.load %arg2[%c14, %c0_31, %c0_32] : memref<15x8x1xbf16, #tpu.memory_space<vmem>>, vector<1x8x1xbf16>
    %131 = vector.shape_cast %130 : vector<1x8x1xbf16> to vector<8x1xbf16>
    %132 = arith.extf %131 : vector<8x1xbf16> to vector<8x1xf32>
    %133 = arith.extf %129 : vector<1x128xbf16> to vector<1x128xf32>
    %134 = vector.broadcast %132 : vector<8x1xf32> to vector<8x128xf32>
    %135 = vector.broadcast %133 : vector<1x128xf32> to vector<8x128xf32>
    %136 = arith.mulf %134, %135 : vector<8x128xf32>
    %137 = arith.addf %128, %136 : vector<8x128xf32>
    %c0_33 = arith.constant 0 : index
    %c0_34 = arith.constant 0 : index
    %138 = vector.load %arg7[%c0_33, %c0_34] : memref<8x1xf32, #tpu.memory_space<vmem>>, vector<8x1xf32>
    %139 = vector.broadcast %138 : vector<8x1xf32> to vector<8x128xf32>
    %140 = arith.addf %137, %139 : vector<8x128xf32>
    %cst_35 = arith.constant 0.000000e+00 : f32
    %141 = vector.broadcast %cst_35 : f32 to vector<8x128xf32>
    %142 = arith.cmpf oge, %140, %141 : vector<8x128xf32>
    %cst_36 = arith.constant 2.000000e-01 : f32
    %143 = vector.broadcast %cst_36 : f32 to vector<8x128xf32>
    %144 = arith.mulf %143, %140 : vector<8x128xf32>
    %145 = arith.select %142, %140, %144 : vector<8x128xi1>, vector<8x128xf32>
    %c0_37 = arith.constant 0 : index
    %c0_38 = arith.constant 0 : index
    %c0_39 = arith.constant 0 : index
    %146 = vector.load %arg12[%c0_37, %c0_38, %c0_39] : memref<1x8x128xf32, #tpu.memory_space<vmem>>, vector<1x8x128xf32>
    %147 = vector.shape_cast %146 : vector<1x8x128xf32> to vector<8x128xf32>
    %148 = vector.shape_cast %145 : vector<8x128xf32> to vector<1x8x128xf32>
    tpu.vector_store %arg12[%c0_37, %c0_38, %c0_39], %148 {strides = array<i32>} : memref<1x8x128xf32, #tpu.memory_space<vmem>>, vector<1x8x128xf32>,
    %149 = tpu.iota {dimensions = array<i32: 1>} : vector<8x128xi32>
    %c64_i32 = arith.constant 64 : i32
    %150 = vector.broadcast %c64_i32 : i32 to vector<8x128xi32>
    %151 = arith.cmpi slt, %149, %150 : vector<8x128xi32>
    %cst_40 = arith.constant 0.000000e+00 : f32
    %152 = vector.broadcast %cst_40 : f32 to vector<8x128xf32>
    %153 = arith.select %151, %145, %152 : vector<8x128xi1>, vector<8x128xf32>
    %cst_41 = arith.constant 0.000000e+00 : bf16
    %154 = vector.broadcast %cst_41 : bf16 to vector<8x128xbf16>
    %155 = arith.truncf %153 : vector<8x128xf32> to vector<8x128xbf16>
    %cst_42 = arith.constant 0.000000e+00 : bf16
    %156 = vector.broadcast %cst_42 : bf16 to vector<8x128xbf16>
    %157 = tpu.concatenate %154, %155, %156 in 1 : vector<8x128xbf16>, vector<8x128xbf16>, vector<8x128xbf16> -> vector<8x384xbf16>
    %cst_43 = arith.constant 0.000000e+00 : f32
    %158 = vector.broadcast %cst_43 : f32 to vector<8x128xf32>
    %159 = vector.extract_strided_slice %157 {offsets = [0, 123], sizes = [8, 128], strides = [1, 1]} : vector<8x384xbf16> to vector<8x128xbf16>
    %c0_44 = arith.constant 0 : index
    %c0_45 = arith.constant 0 : index
    %c0_46 = arith.constant 0 : index
    %160 = vector.load %arg3[%c0_44, %c0_45, %c0_46] : memref<11x8x8xbf16, #tpu.memory_space<vmem>>, vector<1x8x8xbf16>
    %161 = vector.shape_cast %160 : vector<1x8x8xbf16> to vector<8x8xbf16>
    %cst_47 = arith.constant dense<0.000000e+00> : vector<8x128xf32>
    %162 = tpu.matmul %161, %159, %cst_47 {dimension_numbers = #tpu.dot_dimension_numbers<[1], [0], [0], [1], [0, 0, 1, 1], [], []>} : vector<8x8xbf16>, vector<8x128xbf16>, vector<8x128xf32> -> vector<8x128xf32>
    %163 = arith.addf %158, %162 : vector<8x128xf32>
    %164 = vector.extract_strided_slice %157 {offsets = [0, 124], sizes = [8, 128], strides = [1, 1]} : vector<8x384xbf16> to vector<8x128xbf16>
    %c1_48 = arith.constant 1 : index
    %c0_49 = arith.constant 0 : index
    %c0_50 = arith.constant 0 : index
    %165 = vector.load %arg3[%c1_48, %c0_49, %c0_50] : memref<11x8x8xbf16, #tpu.memory_space<vmem>>, vector<1x8x8xbf16>
    %166 = vector.shape_cast %165 : vector<1x8x8xbf16> to vector<8x8xbf16>
    %cst_51 = arith.constant dense<0.000000e+00> : vector<8x128xf32>
    %167 = tpu.matmul %166, %164, %cst_51 {dimension_numbers = #tpu.dot_dimension_numbers<[1], [0], [0], [1], [0, 0, 1, 1], [], []>} : vector<8x8xbf16>, vector<8x128xbf16>, vector<8x128xf32> -> vector<8x128xf32>
    %168 = arith.addf %163, %167 : vector<8x128xf32>
    %169 = vector.extract_strided_slice %157 {offsets = [0, 125], sizes = [8, 128], strides = [1, 1]} : vector<8x384xbf16> to vector<8x128xbf16>
    %c2_52 = arith.constant 2 : index
    %c0_53 = arith.constant 0 : index
    %c0_54 = arith.constant 0 : index
    %170 = vector.load %arg3[%c2_52, %c0_53, %c0_54] : memref<11x8x8xbf16, #tpu.memory_space<vmem>>, vector<1x8x8xbf16>
    %171 = vector.shape_cast %170 : vector<1x8x8xbf16> to vector<8x8xbf16>
    %cst_55 = arith.constant dense<0.000000e+00> : vector<8x128xf32>
    %172 = tpu.matmul %171, %169, %cst_55 {dimension_numbers = #tpu.dot_dimension_numbers<[1], [0], [0], [1], [0, 0, 1, 1], [], []>} : vector<8x8xbf16>, vector<8x128xbf16>, vector<8x128xf32> -> vector<8x128xf32>
    %173 = arith.addf %168, %172 : vector<8x128xf32>
    %174 = vector.extract_strided_slice %157 {offsets = [0, 126], sizes = [8, 128], strides = [1, 1]} : vector<8x384xbf16> to vector<8x128xbf16>
    %c3_56 = arith.constant 3 : index
    %c0_57 = arith.constant 0 : index
    %c0_58 = arith.constant 0 : index
    %175 = vector.load %arg3[%c3_56, %c0_57, %c0_58] : memref<11x8x8xbf16, #tpu.memory_space<vmem>>, vector<1x8x8xbf16>
    %176 = vector.shape_cast %175 : vector<1x8x8xbf16> to vector<8x8xbf16>
    %cst_59 = arith.constant dense<0.000000e+00> : vector<8x128xf32>
    %177 = tpu.matmul %176, %174, %cst_59 {dimension_numbers = #tpu.dot_dimension_numbers<[1], [0], [0], [1], [0, 0, 1, 1], [], []>} : vector<8x8xbf16>, vector<8x128xbf16>, vector<8x128xf32> -> vector<8x128xf32>
    %178 = arith.addf %173, %177 : vector<8x128xf32>
    %179 = vector.extract_strided_slice %157 {offsets = [0, 127], sizes = [8, 128], strides = [1, 1]} : vector<8x384xbf16> to vector<8x128xbf16>
    %c4_60 = arith.constant 4 : index
    %c0_61 = arith.constant 0 : index
    %c0_62 = arith.constant 0 : index
    %180 = vector.load %arg3[%c4_60, %c0_61, %c0_62] : memref<11x8x8xbf16, #tpu.memory_space<vmem>>, vector<1x8x8xbf16>
    %181 = vector.shape_cast %180 : vector<1x8x8xbf16> to vector<8x8xbf16>
    %cst_63 = arith.constant dense<0.000000e+00> : vector<8x128xf32>
    %182 = tpu.matmul %181, %179, %cst_63 {dimension_numbers = #tpu.dot_dimension_numbers<[1], [0], [0], [1], [0, 0, 1, 1], [], []>} : vector<8x8xbf16>, vector<8x128xbf16>, vector<8x128xf32> -> vector<8x128xf32>
    %183 = arith.addf %178, %182 : vector<8x128xf32>
    %184 = vector.extract_strided_slice %157 {offsets = [0, 128], sizes = [8, 128], strides = [1, 1]} : vector<8x384xbf16> to vector<8x128xbf16>
    %c5_64 = arith.constant 5 : index
    %c0_65 = arith.constant 0 : index
    %c0_66 = arith.constant 0 : index
    %185 = vector.load %arg3[%c5_64, %c0_65, %c0_66] : memref<11x8x8xbf16, #tpu.memory_space<vmem>>, vector<1x8x8xbf16>
    %186 = vector.shape_cast %185 : vector<1x8x8xbf16> to vector<8x8xbf16>
    %cst_67 = arith.constant dense<0.000000e+00> : vector<8x128xf32>
    %187 = tpu.matmul %186, %184, %cst_67 {dimension_numbers = #tpu.dot_dimension_numbers<[1], [0], [0], [1], [0, 0, 1, 1], [], []>} : vector<8x8xbf16>, vector<8x128xbf16>, vector<8x128xf32> -> vector<8x128xf32>
    %188 = arith.addf %183, %187 : vector<8x128xf32>
    %189 = vector.extract_strided_slice %157 {offsets = [0, 129], sizes = [8, 128], strides = [1, 1]} : vector<8x384xbf16> to vector<8x128xbf16>
    %c6_68 = arith.constant 6 : index
    %c0_69 = arith.constant 0 : index
    %c0_70 = arith.constant 0 : index
    %190 = vector.load %arg3[%c6_68, %c0_69, %c0_70] : memref<11x8x8xbf16, #tpu.memory_space<vmem>>, vector<1x8x8xbf16>
    %191 = vector.shape_cast %190 : vector<1x8x8xbf16> to vector<8x8xbf16>
    %cst_71 = arith.constant dense<0.000000e+00> : vector<8x128xf32>
    %192 = tpu.matmul %191, %189, %cst_71 {dimension_numbers = #tpu.dot_dimension_numbers<[1], [0], [0], [1], [0, 0, 1, 1], [], []>} : vector<8x8xbf16>, vector<8x128xbf16>, vector<8x128xf32> -> vector<8x128xf32>
    %193 = arith.addf %188, %192 : vector<8x128xf32>
    %194 = vector.extract_strided_slice %157 {offsets = [0, 130], sizes = [8, 128], strides = [1, 1]} : vector<8x384xbf16> to vector<8x128xbf16>
    %c7_72 = arith.constant 7 : index
    %c0_73 = arith.constant 0 : index
    %c0_74 = arith.constant 0 : index
    %195 = vector.load %arg3[%c7_72, %c0_73, %c0_74] : memref<11x8x8xbf16, #tpu.memory_space<vmem>>, vector<1x8x8xbf16>
    %196 = vector.shape_cast %195 : vector<1x8x8xbf16> to vector<8x8xbf16>
    %cst_75 = arith.constant dense<0.000000e+00> : vector<8x128xf32>
    %197 = tpu.matmul %196, %194, %cst_75 {dimension_numbers = #tpu.dot_dimension_numbers<[1], [0], [0], [1], [0, 0, 1, 1], [], []>} : vector<8x8xbf16>, vector<8x128xbf16>, vector<8x128xf32> -> vector<8x128xf32>
    %198 = arith.addf %193, %197 : vector<8x128xf32>
    %199 = vector.extract_strided_slice %157 {offsets = [0, 131], sizes = [8, 128], strides = [1, 1]} : vector<8x384xbf16> to vector<8x128xbf16>
    %c8_76 = arith.constant 8 : index
    %c0_77 = arith.constant 0 : index
    %c0_78 = arith.constant 0 : index
    %200 = vector.load %arg3[%c8_76, %c0_77, %c0_78] : memref<11x8x8xbf16, #tpu.memory_space<vmem>>, vector<1x8x8xbf16>
    %201 = vector.shape_cast %200 : vector<1x8x8xbf16> to vector<8x8xbf16>
    %cst_79 = arith.constant dense<0.000000e+00> : vector<8x128xf32>
    %202 = tpu.matmul %201, %199, %cst_79 {dimension_numbers = #tpu.dot_dimension_numbers<[1], [0], [0], [1], [0, 0, 1, 1], [], []>} : vector<8x8xbf16>, vector<8x128xbf16>, vector<8x128xf32> -> vector<8x128xf32>
    %203 = arith.addf %198, %202 : vector<8x128xf32>
    %204 = vector.extract_strided_slice %157 {offsets = [0, 132], sizes = [8, 128], strides = [1, 1]} : vector<8x384xbf16> to vector<8x128xbf16>
    %c9_80 = arith.constant 9 : index
    %c0_81 = arith.constant 0 : index
    %c0_82 = arith.constant 0 : index
    %205 = vector.load %arg3[%c9_80, %c0_81, %c0_82] : memref<11x8x8xbf16, #tpu.memory_space<vmem>>, vector<1x8x8xbf16>
    %206 = vector.shape_cast %205 : vector<1x8x8xbf16> to vector<8x8xbf16>
    %cst_83 = arith.constant dense<0.000000e+00> : vector<8x128xf32>
    %207 = tpu.matmul %206, %204, %cst_83 {dimension_numbers = #tpu.dot_dimension_numbers<[1], [0], [0], [1], [0, 0, 1, 1], [], []>} : vector<8x8xbf16>, vector<8x128xbf16>, vector<8x128xf32> -> vector<8x128xf32>
    %208 = arith.addf %203, %207 : vector<8x128xf32>
    %209 = vector.extract_strided_slice %157 {offsets = [0, 133], sizes = [8, 128], strides = [1, 1]} : vector<8x384xbf16> to vector<8x128xbf16>
    %c10_84 = arith.constant 10 : index
    %c0_85 = arith.constant 0 : index
    %c0_86 = arith.constant 0 : index
    %210 = vector.load %arg3[%c10_84, %c0_85, %c0_86] : memref<11x8x8xbf16, #tpu.memory_space<vmem>>, vector<1x8x8xbf16>
    %211 = vector.shape_cast %210 : vector<1x8x8xbf16> to vector<8x8xbf16>
    %cst_87 = arith.constant dense<0.000000e+00> : vector<8x128xf32>
    %212 = tpu.matmul %211, %209, %cst_87 {dimension_numbers = #tpu.dot_dimension_numbers<[1], [0], [0], [1], [0, 0, 1, 1], [], []>} : vector<8x8xbf16>, vector<8x128xbf16>, vector<8x128xf32> -> vector<8x128xf32>
    %213 = arith.addf %208, %212 : vector<8x128xf32>
    %c0_88 = arith.constant 0 : index
    %c0_89 = arith.constant 0 : index
    %214 = vector.load %arg8[%c0_88, %c0_89] : memref<8x1xf32, #tpu.memory_space<vmem>>, vector<8x1xf32>
    %215 = vector.broadcast %214 : vector<8x1xf32> to vector<8x128xf32>
    %216 = arith.addf %213, %215 : vector<8x128xf32>
    %cst_90 = arith.constant 0.000000e+00 : f32
    %217 = vector.broadcast %cst_90 : f32 to vector<8x128xf32>
    %218 = arith.cmpf oge, %216, %217 : vector<8x128xf32>
    %cst_91 = arith.constant 2.000000e-01 : f32
    %219 = vector.broadcast %cst_91 : f32 to vector<8x128xf32>
    %220 = arith.mulf %219, %216 : vector<8x128xf32>
    %221 = arith.select %218, %216, %220 : vector<8x128xi1>, vector<8x128xf32>
    %c0_92 = arith.constant 0 : index
    %c0_93 = arith.constant 0 : index
    %c0_94 = arith.constant 0 : index
    %222 = vector.load %arg13[%c0_92, %c0_93, %c0_94] : memref<1x8x128xf32, #tpu.memory_space<vmem>>, vector<1x8x128xf32>
    %223 = vector.shape_cast %222 : vector<1x8x128xf32> to vector<8x128xf32>
    %224 = vector.shape_cast %221 : vector<8x128xf32> to vector<1x8x128xf32>
    tpu.vector_store %arg13[%c0_92, %c0_93, %c0_94], %224 {strides = array<i32>} : memref<1x8x128xf32, #tpu.memory_space<vmem>>, vector<1x8x128xf32>,
    %225 = tpu.iota {dimensions = array<i32: 1>} : vector<8x128xi32>
    %c64_i32_95 = arith.constant 64 : i32
    %226 = vector.broadcast %c64_i32_95 : i32 to vector<8x128xi32>
    %227 = arith.cmpi slt, %225, %226 : vector<8x128xi32>
    %cst_96 = arith.constant 0.000000e+00 : f32
    %228 = vector.broadcast %cst_96 : f32 to vector<8x128xf32>
    %229 = arith.select %227, %221, %228 : vector<8x128xi1>, vector<8x128xf32>
    %cst_97 = arith.constant 0.000000e+00 : bf16
    %230 = vector.broadcast %cst_97 : bf16 to vector<8x128xbf16>
    %231 = arith.truncf %229 : vector<8x128xf32> to vector<8x128xbf16>
    %cst_98 = arith.constant 0.000000e+00 : bf16
    %232 = vector.broadcast %cst_98 : bf16 to vector<8x128xbf16>
    %233 = tpu.concatenate %230, %231, %232 in 1 : vector<8x128xbf16>, vector<8x128xbf16>, vector<8x128xbf16> -> vector<8x384xbf16>
    %cst_99 = arith.constant 0.000000e+00 : f32
    %234 = vector.broadcast %cst_99 : f32 to vector<8x128xf32>
    %235 = vector.extract_strided_slice %233 {offsets = [0, 123], sizes = [8, 128], strides = [1, 1]} : vector<8x384xbf16> to vector<8x128xbf16>
    %c0_100 = arith.constant 0 : index
    %c0_101 = arith.constant 0 : index
    %c0_102 = arith.constant 0 : index
    %236 = vector.load %arg4[%c0_100, %c0_101, %c0_102] : memref<11x8x8xbf16, #tpu.memory_space<vmem>>, vector<1x8x8xbf16>
    %237 = vector.shape_cast %236 : vector<1x8x8xbf16> to vector<8x8xbf16>
    %cst_103 = arith.constant dense<0.000000e+00> : vector<8x128xf32>
    %238 = tpu.matmul %237, %235, %cst_103 {dimension_numbers = #tpu.dot_dimension_numbers<[1], [0], [0], [1], [0, 0, 1, 1], [], []>} : vector<8x8xbf16>, vector<8x128xbf16>, vector<8x128xf32> -> vector<8x128xf32>
    %239 = arith.addf %234, %238 : vector<8x128xf32>
    %240 = vector.extract_strided_slice %233 {offsets = [0, 124], sizes = [8, 128], strides = [1, 1]} : vector<8x384xbf16> to vector<8x128xbf16>
    %c1_104 = arith.constant 1 : index
    %c0_105 = arith.constant 0 : index
    %c0_106 = arith.constant 0 : index
    %241 = vector.load %arg4[%c1_104, %c0_105, %c0_106] : memref<11x8x8xbf16, #tpu.memory_space<vmem>>, vector<1x8x8xbf16>
    %242 = vector.shape_cast %241 : vector<1x8x8xbf16> to vector<8x8xbf16>
    %cst_107 = arith.constant dense<0.000000e+00> : vector<8x128xf32>
    %243 = tpu.matmul %242, %240, %cst_107 {dimension_numbers = #tpu.dot_dimension_numbers<[1], [0], [0], [1], [0, 0, 1, 1], [], []>} : vector<8x8xbf16>, vector<8x128xbf16>, vector<8x128xf32> -> vector<8x128xf32>
    %244 = arith.addf %239, %243 : vector<8x128xf32>
    %245 = vector.extract_strided_slice %233 {offsets = [0, 125], sizes = [8, 128], strides = [1, 1]} : vector<8x384xbf16> to vector<8x128xbf16>
    %c2_108 = arith.constant 2 : index
    %c0_109 = arith.constant 0 : index
    %c0_110 = arith.constant 0 : index
    %246 = vector.load %arg4[%c2_108, %c0_109, %c0_110] : memref<11x8x8xbf16, #tpu.memory_space<vmem>>, vector<1x8x8xbf16>
    %247 = vector.shape_cast %246 : vector<1x8x8xbf16> to vector<8x8xbf16>
    %cst_111 = arith.constant dense<0.000000e+00> : vector<8x128xf32>
    %248 = tpu.matmul %247, %245, %cst_111 {dimension_numbers = #tpu.dot_dimension_numbers<[1], [0], [0], [1], [0, 0, 1, 1], [], []>} : vector<8x8xbf16>, vector<8x128xbf16>, vector<8x128xf32> -> vector<8x128xf32>
    %249 = arith.addf %244, %248 : vector<8x128xf32>
    %250 = vector.extract_strided_slice %233 {offsets = [0, 126], sizes = [8, 128], strides = [1, 1]} : vector<8x384xbf16> to vector<8x128xbf16>
    %c3_112 = arith.constant 3 : index
    %c0_113 = arith.constant 0 : index
    %c0_114 = arith.constant 0 : index
    %251 = vector.load %arg4[%c3_112, %c0_113, %c0_114] : memref<11x8x8xbf16, #tpu.memory_space<vmem>>, vector<1x8x8xbf16>
    %252 = vector.shape_cast %251 : vector<1x8x8xbf16> to vector<8x8xbf16>
    %cst_115 = arith.constant dense<0.000000e+00> : vector<8x128xf32>
    %253 = tpu.matmul %252, %250, %cst_115 {dimension_numbers = #tpu.dot_dimension_numbers<[1], [0], [0], [1], [0, 0, 1, 1], [], []>} : vector<8x8xbf16>, vector<8x128xbf16>, vector<8x128xf32> -> vector<8x128xf32>
    %254 = arith.addf %249, %253 : vector<8x128xf32>
    %255 = vector.extract_strided_slice %233 {offsets = [0, 127], sizes = [8, 128], strides = [1, 1]} : vector<8x384xbf16> to vector<8x128xbf16>
    %c4_116 = arith.constant 4 : index
    %c0_117 = arith.constant 0 : index
    %c0_118 = arith.constant 0 : index
    %256 = vector.load %arg4[%c4_116, %c0_117, %c0_118] : memref<11x8x8xbf16, #tpu.memory_space<vmem>>, vector<1x8x8xbf16>
    %257 = vector.shape_cast %256 : vector<1x8x8xbf16> to vector<8x8xbf16>
    %cst_119 = arith.constant dense<0.000000e+00> : vector<8x128xf32>
    %258 = tpu.matmul %257, %255, %cst_119 {dimension_numbers = #tpu.dot_dimension_numbers<[1], [0], [0], [1], [0, 0, 1, 1], [], []>} : vector<8x8xbf16>, vector<8x128xbf16>, vector<8x128xf32> -> vector<8x128xf32>
    %259 = arith.addf %254, %258 : vector<8x128xf32>
    %260 = vector.extract_strided_slice %233 {offsets = [0, 128], sizes = [8, 128], strides = [1, 1]} : vector<8x384xbf16> to vector<8x128xbf16>
    %c5_120 = arith.constant 5 : index
    %c0_121 = arith.constant 0 : index
    %c0_122 = arith.constant 0 : index
    %261 = vector.load %arg4[%c5_120, %c0_121, %c0_122] : memref<11x8x8xbf16, #tpu.memory_space<vmem>>, vector<1x8x8xbf16>
    %262 = vector.shape_cast %261 : vector<1x8x8xbf16> to vector<8x8xbf16>
    %cst_123 = arith.constant dense<0.000000e+00> : vector<8x128xf32>
    %263 = tpu.matmul %262, %260, %cst_123 {dimension_numbers = #tpu.dot_dimension_numbers<[1], [0], [0], [1], [0, 0, 1, 1], [], []>} : vector<8x8xbf16>, vector<8x128xbf16>, vector<8x128xf32> -> vector<8x128xf32>
    %264 = arith.addf %259, %263 : vector<8x128xf32>
    %265 = vector.extract_strided_slice %233 {offsets = [0, 129], sizes = [8, 128], strides = [1, 1]} : vector<8x384xbf16> to vector<8x128xbf16>
    %c6_124 = arith.constant 6 : index
    %c0_125 = arith.constant 0 : index
    %c0_126 = arith.constant 0 : index
    %266 = vector.load %arg4[%c6_124, %c0_125, %c0_126] : memref<11x8x8xbf16, #tpu.memory_space<vmem>>, vector<1x8x8xbf16>
    %267 = vector.shape_cast %266 : vector<1x8x8xbf16> to vector<8x8xbf16>
    %cst_127 = arith.constant dense<0.000000e+00> : vector<8x128xf32>
    %268 = tpu.matmul %267, %265, %cst_127 {dimension_numbers = #tpu.dot_dimension_numbers<[1], [0], [0], [1], [0, 0, 1, 1], [], []>} : vector<8x8xbf16>, vector<8x128xbf16>, vector<8x128xf32> -> vector<8x128xf32>
    %269 = arith.addf %264, %268 : vector<8x128xf32>
    %270 = vector.extract_strided_slice %233 {offsets = [0, 130], sizes = [8, 128], strides = [1, 1]} : vector<8x384xbf16> to vector<8x128xbf16>
    %c7_128 = arith.constant 7 : index
    %c0_129 = arith.constant 0 : index
    %c0_130 = arith.constant 0 : index
    %271 = vector.load %arg4[%c7_128, %c0_129, %c0_130] : memref<11x8x8xbf16, #tpu.memory_space<vmem>>, vector<1x8x8xbf16>
    %272 = vector.shape_cast %271 : vector<1x8x8xbf16> to vector<8x8xbf16>
    %cst_131 = arith.constant dense<0.000000e+00> : vector<8x128xf32>
    %273 = tpu.matmul %272, %270, %cst_131 {dimension_numbers = #tpu.dot_dimension_numbers<[1], [0], [0], [1], [0, 0, 1, 1], [], []>} : vector<8x8xbf16>, vector<8x128xbf16>, vector<8x128xf32> -> vector<8x128xf32>
    %274 = arith.addf %269, %273 : vector<8x128xf32>
    %275 = vector.extract_strided_slice %233 {offsets = [0, 131], sizes = [8, 128], strides = [1, 1]} : vector<8x384xbf16> to vector<8x128xbf16>
    %c8_132 = arith.constant 8 : index
    %c0_133 = arith.constant 0 : index
    %c0_134 = arith.constant 0 : index
    %276 = vector.load %arg4[%c8_132, %c0_133, %c0_134] : memref<11x8x8xbf16, #tpu.memory_space<vmem>>, vector<1x8x8xbf16>
    %277 = vector.shape_cast %276 : vector<1x8x8xbf16> to vector<8x8xbf16>
    %cst_135 = arith.constant dense<0.000000e+00> : vector<8x128xf32>
    %278 = tpu.matmul %277, %275, %cst_135 {dimension_numbers = #tpu.dot_dimension_numbers<[1], [0], [0], [1], [0, 0, 1, 1], [], []>} : vector<8x8xbf16>, vector<8x128xbf16>, vector<8x128xf32> -> vector<8x128xf32>
    %279 = arith.addf %274, %278 : vector<8x128xf32>
    %280 = vector.extract_strided_slice %233 {offsets = [0, 132], sizes = [8, 128], strides = [1, 1]} : vector<8x384xbf16> to vector<8x128xbf16>
    %c9_136 = arith.constant 9 : index
    %c0_137 = arith.constant 0 : index
    %c0_138 = arith.constant 0 : index
    %281 = vector.load %arg4[%c9_136, %c0_137, %c0_138] : memref<11x8x8xbf16, #tpu.memory_space<vmem>>, vector<1x8x8xbf16>
    %282 = vector.shape_cast %281 : vector<1x8x8xbf16> to vector<8x8xbf16>
    %cst_139 = arith.constant dense<0.000000e+00> : vector<8x128xf32>
    %283 = tpu.matmul %282, %280, %cst_139 {dimension_numbers = #tpu.dot_dimension_numbers<[1], [0], [0], [1], [0, 0, 1, 1], [], []>} : vector<8x8xbf16>, vector<8x128xbf16>, vector<8x128xf32> -> vector<8x128xf32>
    %284 = arith.addf %279, %283 : vector<8x128xf32>
    %285 = vector.extract_strided_slice %233 {offsets = [0, 133], sizes = [8, 128], strides = [1, 1]} : vector<8x384xbf16> to vector<8x128xbf16>
    %c10_140 = arith.constant 10 : index
    %c0_141 = arith.constant 0 : index
    %c0_142 = arith.constant 0 : index
    %286 = vector.load %arg4[%c10_140, %c0_141, %c0_142] : memref<11x8x8xbf16, #tpu.memory_space<vmem>>, vector<1x8x8xbf16>
    %287 = vector.shape_cast %286 : vector<1x8x8xbf16> to vector<8x8xbf16>
    %cst_143 = arith.constant dense<0.000000e+00> : vector<8x128xf32>
    %288 = tpu.matmul %287, %285, %cst_143 {dimension_numbers = #tpu.dot_dimension_numbers<[1], [0], [0], [1], [0, 0, 1, 1], [], []>} : vector<8x8xbf16>, vector<8x128xbf16>, vector<8x128xf32> -> vector<8x128xf32>
    %289 = arith.addf %284, %288 : vector<8x128xf32>
    %c0_144 = arith.constant 0 : index
    %c0_145 = arith.constant 0 : index
    %290 = vector.load %arg9[%c0_144, %c0_145] : memref<8x1xf32, #tpu.memory_space<vmem>>, vector<8x1xf32>
    %291 = vector.broadcast %290 : vector<8x1xf32> to vector<8x128xf32>
    %292 = arith.addf %289, %291 : vector<8x128xf32>
    %cst_146 = arith.constant 0.000000e+00 : f32
    %293 = vector.broadcast %cst_146 : f32 to vector<8x128xf32>
    %294 = arith.cmpf oge, %292, %293 : vector<8x128xf32>
    %cst_147 = arith.constant 2.000000e-01 : f32
    %295 = vector.broadcast %cst_147 : f32 to vector<8x128xf32>
    %296 = arith.mulf %295, %292 : vector<8x128xf32>
    %297 = arith.select %294, %292, %296 : vector<8x128xi1>, vector<8x128xf32>
    %c0_148 = arith.constant 0 : index
    %c0_149 = arith.constant 0 : index
    %c0_150 = arith.constant 0 : index
    %298 = vector.load %arg14[%c0_148, %c0_149, %c0_150] : memref<1x8x128xf32, #tpu.memory_space<vmem>>, vector<1x8x128xf32>
    %299 = vector.shape_cast %298 : vector<1x8x128xf32> to vector<8x128xf32>
    %300 = vector.shape_cast %297 : vector<8x128xf32> to vector<1x8x128xf32>
    tpu.vector_store %arg14[%c0_148, %c0_149, %c0_150], %300 {strides = array<i32>} : memref<1x8x128xf32, #tpu.memory_space<vmem>>, vector<1x8x128xf32>,
    %301 = tpu.iota {dimensions = array<i32: 1>} : vector<8x128xi32>
    %c64_i32_151 = arith.constant 64 : i32
    %302 = vector.broadcast %c64_i32_151 : i32 to vector<8x128xi32>
    %303 = arith.cmpi slt, %301, %302 : vector<8x128xi32>
    %cst_152 = arith.constant 0.000000e+00 : f32
    %304 = vector.broadcast %cst_152 : f32 to vector<8x128xf32>
    %305 = arith.select %303, %297, %304 : vector<8x128xi1>, vector<8x128xf32>
    %cst_153 = arith.constant 0.000000e+00 : bf16
    %306 = vector.broadcast %cst_153 : bf16 to vector<8x128xbf16>
    %307 = arith.truncf %305 : vector<8x128xf32> to vector<8x128xbf16>
    %cst_154 = arith.constant 0.000000e+00 : bf16
    %308 = vector.broadcast %cst_154 : bf16 to vector<8x128xbf16>
    %309 = tpu.concatenate %306, %307, %308 in 1 : vector<8x128xbf16>, vector<8x128xbf16>, vector<8x128xbf16> -> vector<8x384xbf16>
    %cst_155 = arith.constant 0.000000e+00 : f32
    %310 = vector.broadcast %cst_155 : f32 to vector<16x128xf32>
    %311 = vector.extract_strided_slice %309 {offsets = [0, 126], sizes = [8, 128], strides = [1, 1]} : vector<8x384xbf16> to vector<8x128xbf16>
    %c0_156 = arith.constant 0 : index
    %c0_157 = arith.constant 0 : index
    %c0_158 = arith.constant 0 : index
    %312 = vector.load %arg5[%c0_156, %c0_157, %c0_158] : memref<5x16x8xbf16, #tpu.memory_space<vmem>>, vector<1x16x8xbf16>
    %313 = vector.shape_cast %312 : vector<1x16x8xbf16> to vector<16x8xbf16>
    %cst_159 = arith.constant dense<0.000000e+00> : vector<16x128xf32>
    %314 = tpu.matmul %313, %311, %cst_159 {dimension_numbers = #tpu.dot_dimension_numbers<[1], [0], [0], [1], [0, 0, 1, 1], [], []>} : vector<16x8xbf16>, vector<8x128xbf16>, vector<16x128xf32> -> vector<16x128xf32>
    %315 = arith.addf %310, %314 : vector<16x128xf32>
    %316 = vector.extract_strided_slice %309 {offsets = [0, 127], sizes = [8, 128], strides = [1, 1]} : vector<8x384xbf16> to vector<8x128xbf16>
    %c1_160 = arith.constant 1 : index
    %c0_161 = arith.constant 0 : index
    %c0_162 = arith.constant 0 : index
    %317 = vector.load %arg5[%c1_160, %c0_161, %c0_162] : memref<5x16x8xbf16, #tpu.memory_space<vmem>>, vector<1x16x8xbf16>
    %318 = vector.shape_cast %317 : vector<1x16x8xbf16> to vector<16x8xbf16>
    %cst_163 = arith.constant dense<0.000000e+00> : vector<16x128xf32>
    %319 = tpu.matmul %318, %316, %cst_163 {dimension_numbers = #tpu.dot_dimension_numbers<[1], [0], [0], [1], [0, 0, 1, 1], [], []>} : vector<16x8xbf16>, vector<8x128xbf16>, vector<16x128xf32> -> vector<16x128xf32>
    %320 = arith.addf %315, %319 : vector<16x128xf32>
    %321 = vector.extract_strided_slice %309 {offsets = [0, 128], sizes = [8, 128], strides = [1, 1]} : vector<8x384xbf16> to vector<8x128xbf16>
    %c2_164 = arith.constant 2 : index
    %c0_165 = arith.constant 0 : index
    %c0_166 = arith.constant 0 : index
    %322 = vector.load %arg5[%c2_164, %c0_165, %c0_166] : memref<5x16x8xbf16, #tpu.memory_space<vmem>>, vector<1x16x8xbf16>
    %323 = vector.shape_cast %322 : vector<1x16x8xbf16> to vector<16x8xbf16>
    %cst_167 = arith.constant dense<0.000000e+00> : vector<16x128xf32>
    %324 = tpu.matmul %323, %321, %cst_167 {dimension_numbers = #tpu.dot_dimension_numbers<[1], [0], [0], [1], [0, 0, 1, 1], [], []>} : vector<16x8xbf16>, vector<8x128xbf16>, vector<16x128xf32> -> vector<16x128xf32>
    %325 = arith.addf %320, %324 : vector<16x128xf32>
    %326 = vector.extract_strided_slice %309 {offsets = [0, 129], sizes = [8, 128], strides = [1, 1]} : vector<8x384xbf16> to vector<8x128xbf16>
    %c3_168 = arith.constant 3 : index
    %c0_169 = arith.constant 0 : index
    %c0_170 = arith.constant 0 : index
    %327 = vector.load %arg5[%c3_168, %c0_169, %c0_170] : memref<5x16x8xbf16, #tpu.memory_space<vmem>>, vector<1x16x8xbf16>
    %328 = vector.shape_cast %327 : vector<1x16x8xbf16> to vector<16x8xbf16>
    %cst_171 = arith.constant dense<0.000000e+00> : vector<16x128xf32>
    %329 = tpu.matmul %328, %326, %cst_171 {dimension_numbers = #tpu.dot_dimension_numbers<[1], [0], [0], [1], [0, 0, 1, 1], [], []>} : vector<16x8xbf16>, vector<8x128xbf16>, vector<16x128xf32> -> vector<16x128xf32>
    %330 = arith.addf %325, %329 : vector<16x128xf32>
    %331 = vector.extract_strided_slice %309 {offsets = [0, 130], sizes = [8, 128], strides = [1, 1]} : vector<8x384xbf16> to vector<8x128xbf16>
    %c4_172 = arith.constant 4 : index
    %c0_173 = arith.constant 0 : index
    %c0_174 = arith.constant 0 : index
    %332 = vector.load %arg5[%c4_172, %c0_173, %c0_174] : memref<5x16x8xbf16, #tpu.memory_space<vmem>>, vector<1x16x8xbf16>
    %333 = vector.shape_cast %332 : vector<1x16x8xbf16> to vector<16x8xbf16>
    %cst_175 = arith.constant dense<0.000000e+00> : vector<16x128xf32>
    %334 = tpu.matmul %333, %331, %cst_175 {dimension_numbers = #tpu.dot_dimension_numbers<[1], [0], [0], [1], [0, 0, 1, 1], [], []>} : vector<16x8xbf16>, vector<8x128xbf16>, vector<16x128xf32> -> vector<16x128xf32>
    %335 = arith.addf %330, %334 : vector<16x128xf32>
    %c0_176 = arith.constant 0 : index
    %c0_177 = arith.constant 0 : index
    %336 = vector.load %arg10[%c0_176, %c0_177] : memref<16x1xf32, #tpu.memory_space<vmem>>, vector<16x1xf32>
    %337 = vector.broadcast %336 : vector<16x1xf32> to vector<16x128xf32>
    %338 = arith.addf %335, %337 : vector<16x128xf32>
    %cst_178 = arith.constant 0.000000e+00 : f32
    %339 = vector.broadcast %cst_178 : f32 to vector<16x128xf32>
    %340 = arith.cmpf oge, %338, %339 : vector<16x128xf32>
    %cst_179 = arith.constant 2.000000e-01 : f32
    %341 = vector.broadcast %cst_179 : f32 to vector<16x128xf32>
    %342 = arith.mulf %341, %338 : vector<16x128xf32>
    %343 = arith.select %340, %338, %342 : vector<16x128xi1>, vector<16x128xf32>
    %c0_180 = arith.constant 0 : index
    %c0_181 = arith.constant 0 : index
    %c0_182 = arith.constant 0 : index
    %344 = vector.load %arg15[%c0_180, %c0_181, %c0_182] : memref<1x16x128xf32, #tpu.memory_space<vmem>>, vector<1x16x128xf32>
    %345 = vector.shape_cast %344 : vector<1x16x128xf32> to vector<16x128xf32>
    %346 = vector.shape_cast %343 : vector<16x128xf32> to vector<1x16x128xf32>
    tpu.vector_store %arg15[%c0_180, %c0_181, %c0_182], %346 {strides = array<i32>} : memref<1x16x128xf32, #tpu.memory_space<vmem>>, vector<1x16x128xf32>,
    %347 = tpu.iota {dimensions = array<i32: 1>} : vector<16x128xi32>
    %c64_i32_183 = arith.constant 64 : i32
    %348 = vector.broadcast %c64_i32_183 : i32 to vector<16x128xi32>
    %349 = arith.cmpi slt, %347, %348 : vector<16x128xi32>
    %cst_184 = arith.constant 0.000000e+00 : f32
    %350 = vector.broadcast %cst_184 : f32 to vector<16x128xf32>
    %351 = arith.select %349, %343, %350 : vector<16x128xi1>, vector<16x128xf32>
    %cst_185 = arith.constant 0.000000e+00 : bf16
    %352 = vector.broadcast %cst_185 : bf16 to vector<16x128xbf16>
    %353 = arith.truncf %351 : vector<16x128xf32> to vector<16x128xbf16>
    %cst_186 = arith.constant 0.000000e+00 : bf16
    %354 = vector.broadcast %cst_186 : bf16 to vector<16x128xbf16>
    %355 = tpu.concatenate %352, %353, %354 in 1 : vector<16x128xbf16>, vector<16x128xbf16>, vector<16x128xbf16> -> vector<16x384xbf16>
    %cst_187 = arith.constant 0.000000e+00 : f32
    %356 = vector.broadcast %cst_187 : f32 to vector<1x128xf32>
    %357 = vector.extract_strided_slice %355 {offsets = [0, 127], sizes = [16, 128], strides = [1, 1]} : vector<16x384xbf16> to vector<16x128xbf16>
    %c0_188 = arith.constant 0 : index
    %c0_189 = arith.constant 0 : index
    %c0_190 = arith.constant 0 : index
    %358 = vector.load %arg6[%c0_188, %c0_189, %c0_190] : memref<3x1x16xbf16, #tpu.memory_space<vmem>>, vector<1x1x16xbf16>
    %359 = vector.shape_cast %358 : vector<1x1x16xbf16> to vector<1x16xbf16>
    %cst_191 = arith.constant dense<0.000000e+00> : vector<1x128xf32>
    %360 = tpu.matmul %359, %357, %cst_191 {dimension_numbers = #tpu.dot_dimension_numbers<[1], [0], [0], [1], [0, 0, 1, 1], [], []>} : vector<1x16xbf16>, vector<16x128xbf16>, vector<1x128xf32> -> vector<1x128xf32>
    %361 = arith.addf %356, %360 : vector<1x128xf32>
    %362 = vector.extract_strided_slice %355 {offsets = [0, 128], sizes = [16, 128], strides = [1, 1]} : vector<16x384xbf16> to vector<16x128xbf16>
    %c1_192 = arith.constant 1 : index
    %c0_193 = arith.constant 0 : index
    %c0_194 = arith.constant 0 : index
    %363 = vector.load %arg6[%c1_192, %c0_193, %c0_194] : memref<3x1x16xbf16, #tpu.memory_space<vmem>>, vector<1x1x16xbf16>
    %364 = vector.shape_cast %363 : vector<1x1x16xbf16> to vector<1x16xbf16>
    %cst_195 = arith.constant dense<0.000000e+00> : vector<1x128xf32>
    %365 = tpu.matmul %364, %362, %cst_195 {dimension_numbers = #tpu.dot_dimension_numbers<[1], [0], [0], [1], [0, 0, 1, 1], [], []>} : vector<1x16xbf16>, vector<16x128xbf16>, vector<1x128xf32> -> vector<1x128xf32>
    %366 = arith.addf %361, %365 : vector<1x128xf32>
    %367 = vector.extract_strided_slice %355 {offsets = [0, 129], sizes = [16, 128], strides = [1, 1]} : vector<16x384xbf16> to vector<16x128xbf16>
    %c2_196 = arith.constant 2 : index
    %c0_197 = arith.constant 0 : index
    %c0_198 = arith.constant 0 : index
    %368 = vector.load %arg6[%c2_196, %c0_197, %c0_198] : memref<3x1x16xbf16, #tpu.memory_space<vmem>>, vector<1x1x16xbf16>
    %369 = vector.shape_cast %368 : vector<1x1x16xbf16> to vector<1x16xbf16>
    %cst_199 = arith.constant dense<0.000000e+00> : vector<1x128xf32>
    %370 = tpu.matmul %369, %367, %cst_199 {dimension_numbers = #tpu.dot_dimension_numbers<[1], [0], [0], [1], [0, 0, 1, 1], [], []>} : vector<1x16xbf16>, vector<16x128xbf16>, vector<1x128xf32> -> vector<1x128xf32>
    %371 = arith.addf %366, %370 : vector<1x128xf32>
    %c0_200 = arith.constant 0 : index
    %c0_201 = arith.constant 0 : index
    %372 = vector.load %arg11[%c0_200, %c0_201] : memref<1x1xf32, #tpu.memory_space<vmem>>, vector<1x1xf32>
    %373 = vector.broadcast %372 : vector<1x1xf32> to vector<1x128xf32>
    %374 = arith.addf %371, %373 : vector<1x128xf32>
    %c0_202 = arith.constant 0 : index
    %c0_203 = arith.constant 0 : index
    %c0_204 = arith.constant 0 : index
    %375 = vector.load %arg16[%c0_202, %c0_203, %c0_204] : memref<1x1x128xf32, #tpu.memory_space<vmem>>, vector<1x1x128xf32>
    %376 = vector.shape_cast %375 : vector<1x1x128xf32> to vector<1x128xf32>
    %377 = vector.shape_cast %374 : vector<1x128xf32> to vector<1x1x128xf32>
    tpu.vector_store %arg16[%c0_202, %c0_203, %c0_204], %377 {strides = array<i32>} : memref<1x1x128xf32, #tpu.memory_space<vmem>>, vector<1x1x128xf32>,
    return
  }
  func.func @transform_0(%arg0: i32) -> (i32, i32, i32) {
    %c0_i32 = arith.constant 0 : i32
    %c0_i32_0 = arith.constant 0 : i32
    %c0_i32_1 = arith.constant 0 : i32
    return %arg0, %c0_i32, %c0_i32_0 : i32, i32, i32
  }
  func.func @transform_1(%arg0: i32) -> (i32, i32, i32) {
    %c0_i32 = arith.constant 0 : i32
    %c0_i32_0 = arith.constant 0 : i32
    %c0_i32_1 = arith.constant 0 : i32
    %c0_i32_2 = arith.constant 0 : i32
    return %c0_i32, %c0_i32_0, %c0_i32_1 : i32, i32, i32
  }
  func.func @transform_2(%arg0: i32) -> (i32, i32, i32) {
    %c0_i32 = arith.constant 0 : i32
    %c0_i32_0 = arith.constant 0 : i32
    %c0_i32_1 = arith.constant 0 : i32
    %c0_i32_2 = arith.constant 0 : i32
    return %c0_i32, %c0_i32_0, %c0_i32_1 : i32, i32, i32
  }
  func.func @transform_3(%arg0: i32) -> (i32, i32, i32) {
    %c0_i32 = arith.constant 0 : i32
    %c0_i32_0 = arith.constant 0 : i32
    %c0_i32_1 = arith.constant 0 : i32
    %c0_i32_2 = arith.constant 0 : i32
    return %c0_i32, %c0_i32_0, %c0_i32_1 : i32, i32, i32
  }
  func.func @transform_4(%arg0: i32) -> (i32, i32, i32) {
    %c0_i32 = arith.constant 0 : i32
    %c0_i32_0 = arith.constant 0 : i32
    %c0_i32_1 = arith.constant 0 : i32
    %c0_i32_2 = arith.constant 0 : i32
    return %c0_i32, %c0_i32_0, %c0_i32_1 : i32, i32, i32
  }
  func.func @transform_5(%arg0: i32) -> (i32, i32, i32) {
    %c0_i32 = arith.constant 0 : i32
    %c0_i32_0 = arith.constant 0 : i32
    %c0_i32_1 = arith.constant 0 : i32
    %c0_i32_2 = arith.constant 0 : i32
    return %c0_i32, %c0_i32_0, %c0_i32_1 : i32, i32, i32
  }
  func.func @transform_6(%arg0: i32) -> (i32, i32) {
    %c0_i32 = arith.constant 0 : i32
    %c0_i32_0 = arith.constant 0 : i32
    %c0_i32_1 = arith.constant 0 : i32
    return %c0_i32, %c0_i32_0 : i32, i32
  }
  func.func @transform_7(%arg0: i32) -> (i32, i32) {
    %c0_i32 = arith.constant 0 : i32
    %c0_i32_0 = arith.constant 0 : i32
    %c0_i32_1 = arith.constant 0 : i32
    return %c0_i32, %c0_i32_0 : i32, i32
  }
  func.func @transform_8(%arg0: i32) -> (i32, i32) {
    %c0_i32 = arith.constant 0 : i32
    %c0_i32_0 = arith.constant 0 : i32
    %c0_i32_1 = arith.constant 0 : i32
    return %c0_i32, %c0_i32_0 : i32, i32
  }
  func.func @transform_9(%arg0: i32) -> (i32, i32) {
    %c0_i32 = arith.constant 0 : i32
    %c0_i32_0 = arith.constant 0 : i32
    %c0_i32_1 = arith.constant 0 : i32
    return %c0_i32, %c0_i32_0 : i32, i32
  }
  func.func @transform_10(%arg0: i32) -> (i32, i32) {
    %c0_i32 = arith.constant 0 : i32
    %c0_i32_0 = arith.constant 0 : i32
    %c0_i32_1 = arith.constant 0 : i32
    return %c0_i32, %c0_i32_0 : i32, i32
  }
  func.func @transform_11(%arg0: i32) -> (i32, i32, i32) {
    %c0_i32 = arith.constant 0 : i32
    %c0_i32_0 = arith.constant 0 : i32
    %c0_i32_1 = arith.constant 0 : i32
    return %arg0, %c0_i32, %c0_i32_0 : i32, i32, i32
  }
  func.func @transform_12(%arg0: i32) -> (i32, i32, i32) {
    %c0_i32 = arith.constant 0 : i32
    %c0_i32_0 = arith.constant 0 : i32
    %c0_i32_1 = arith.constant 0 : i32
    return %arg0, %c0_i32, %c0_i32_0 : i32, i32, i32
  }
  func.func @transform_13(%arg0: i32) -> (i32, i32, i32) {
    %c0_i32 = arith.constant 0 : i32
    %c0_i32_0 = arith.constant 0 : i32
    %c0_i32_1 = arith.constant 0 : i32
    return %arg0, %c0_i32, %c0_i32_0 : i32, i32, i32
  }
  func.func @transform_14(%arg0: i32) -> (i32, i32, i32) {
    %c0_i32 = arith.constant 0 : i32
    %c0_i32_0 = arith.constant 0 : i32
    %c0_i32_1 = arith.constant 0 : i32
    return %arg0, %c0_i32, %c0_i32_0 : i32, i32, i32
  }
  func.func @transform_15(%arg0: i32) -> (i32, i32, i32) {
    %c0_i32 = arith.constant 0 : i32
    %c0_i32_0 = arith.constant 0 : i32
    %c0_i32_1 = arith.constant 0 : i32
    return %arg0, %c0_i32, %c0_i32_0 : i32, i32, i32
  }
}

</mosaic_0001>

<bundles_post_ra>
// kernel: tpu_custom_call.1
= control target key start
LH: loop header
LB: loop body
LE: loop exit
PB: predicated region body
PF: predicated region fallthrough
CT: control target
= control target key end

     0   :  { %s3111_s0 = inlined_call_operand.vmem [shape: bf16[2,1,384], index: 0, kind: input, shape index: {}]   ;;  %s3112_s1 = inlined_call_operand.vmem [shape: bf16[15,8,1], index: 1, kind: input, shape index: {}]   ;;  %s3113_s2 = inlined_call_operand.vmem [shape: bf16[11,8,8], index: 2, kind: input, shape index: {}]   ;;  %s3114_s3 = inlined_call_operand.vmem [shape: bf16[11,8,8], index: 3, kind: input, shape index: {}]   ;;  %s3115_s4 = inlined_call_operand.vmem [shape: bf16[5,16,8], index: 4, kind: input, shape index: {}]   ;;  %s3116_s5 = inlined_call_operand.vmem [shape: bf16[3,1,16], index: 5, kind: input, shape index: {}]   ;;  %s3117_s6 = inlined_call_operand.vmem [shape: f32[8,1], index: 6, kind: input, shape index: {}]   ;;  %s3118_s7 = inlined_call_operand.vmem [shape: f32[8,1], index: 7, kind: input, shape index: {}]   ;;  %s3119_s8 = inlined_call_operand.vmem [shape: f32[8,1], index: 8, kind: input, shape index: {}]   ;;  %s3120_s9 = inlined_call_operand.vmem [shape: f32[16,1], index: 9, kind: input, shape index: {}]   ;;  %s3121_s10 = inlined_call_operand.<no memory space> [shape: f32[1,1], index: 10, kind: input, shape index: {}]   ;;  %s3122_s11 = inlined_call_operand.hbm [shape: f32[2,8,128], index: 11, kind: output, shape index: {0}]   ;;  %s3123_s12 = inlined_call_operand.hbm [shape: f32[2,8,128], index: 12, kind: output, shape index: {1}]   ;;  %s3124_s13 = inlined_call_operand.hbm [shape: f32[2,8,128], index: 13, kind: output, shape index: {2}]   ;;  %s3125_s14 = inlined_call_operand.hbm [shape: f32[2,16,128], index: 14, kind: output, shape index: {3}]   ;;  %s3126_s15 = inlined_call_operand.hbm [shape: f32[2,1,128], index: 15, kind: output, shape index: {4}]  }
   0x1   :  { %3151 = sst [smem:[#allocation17_spill]] %s3111_s0  ;;  %v21_v0 = vstv %s3121_s10 }
   0x2   :  { %3152 = sst [smem:[#allocation18_spill]] %s3112_s1  ;;  %22 = vst [vmem:[#allocation2] sm:$0x1] %v21_v0 }
   0x3   :  { %3153 = sst [smem:[#allocation19_spill]] %s3113_s2 }
   0x4   :  { %3154 = sst [smem:[#allocation20_spill]] %s3114_s3 }
   0x5   :  { %3155 = sst [smem:[#allocation21_spill]] %s3115_s4 }
   0x6   :  { %3156 = sst [smem:[#allocation22_spill]] %s3116_s5 }
   0x7   :  { %3157 = sst [smem:[#allocation23_spill]] %s3117_s6 }
   0x8   :  { %3158 = sst [smem:[#allocation24_spill]] %s3118_s7 }
   0x9   :  { %3159 = sst [smem:[#allocation25_spill]] %s3119_s8 }
   0xa   :  { %3160 = sst [smem:[#allocation26_spill]] %s3120_s9 }
   0xb   :  { %3161 = sst [smem:[#allocation27_spill]] %s3123_s12 }
   0xc   :  { %23 = vsyncpa [#allocation4], 0 }
   0xd   :  { %25 = vsyncpa [#allocation4 + $0x1], 0 }
   0xe   :  { %26 = vsyncpa [#allocation6], 0 }
   0xf   :  { %28 = vsyncpa [#allocation6 + $0x1], 0 }
  0x10   :  { %29 = vsyncpa [#allocation9], 0 }
  0x11   :  { %31 = vsyncpa [#allocation9 + $0x1], 0  ;;  %s2541_s20 = smov 0   ;;  %s2543_s21 = smov 0  }
  0x12   :  { %s2545_s22 = smov 0   ;;  %s2547_s23 = smov 0  }
  0x13 LB: > { %3162 = sst [smem:[#allocation14_spill]] %s2432_s21  ;;  %s2562_s10 = sadd.s32 4294967295, %s2440_s23   ;;  %s2440_s23 = sphi %s2547_s23, %s3195_s23   ;;  %s2436_s22 = sphi %s2545_s22, %s3194_s22   ;;  %s2432_s21 = sphi %s2543_s21, %s3193_s21   ;;  %s2428_s20 = sphi %s2541_s20, %s3192_s20  }
  0x14   : > { %3163 = sst [smem:[#allocation15_spill]] %s2436_s22  ;;  %s3127_s24 = sadd.s32 4294967294, %s2440_s23  }
  0x15   : > { %s2566_s25 = sadd.s32 1, %s2440_s23   ;;  %s280_s26 = sadd.s32 1, %s2436_s22 }
  0x16   : > { %s277_s27 = ssub.s32 %s2440_s23, %s2566_s25  ;;  %p290_p0 = scmp.ne.s32.totalorder %s2436_s22, %s2432_s21 }
  0x17   : > { %p278_p1 = scmp.eq.s32.totalorder %s277_s27, 0  ;;  %p291_p2 = scmp.eq.s32.totalorder %s2562_s10, 1 }
  0x18   : > { %p296_p3 = scmp.ne.s32.totalorder %s2432_s21, %s2428_s20  ;;  %p297_p4 = scmp.eq.s32.totalorder %s3127_s24, 1 }
  0x19   : > { %s2579_s28 = scalar_select %p278_p1, %s2436_s22, %s280_s26  }
  0x1a   : > { %p2581_p5 = por %p291_p2, %p290_p0  ;;  %p2585_p6 = por %p297_p4, %p296_p3 }
  0x1b   : > { %3164 = sst [smem:[#allocation16_spill]] %s2579_s28  ;;  %p2028_p7 = scmp.ge.s32.totalorder %s2440_s23, 1 }
  0x1c   : > { %p456_p8 = scmp.lt.s32.totalorder %s2440_s23, 3 }
  0x1e   : > { %p457_p9 = pnand %p2028_p7, %p456_p8 }
  0x1f   : > { %s3167_s1 = sld [smem:[#allocation18_spill]] (!%p457_p9)  ;;  %p522_p10 = scmp.lt.s32.totalorder (!%p457_p9), %s2562_s10, 1 }
  0x20   : > { %460 = sbr.rel (%p457_p9) target bundleno = 1588 (0x634), region = 64  ;;  %s3168_s0 = sld [smem:[#allocation17_spill]] (!%p457_p9) }
  0x21   : > { %s3128_s28 = smov (!%p457_p9), 126   ;;  %s3130_s18 = smov (!%p457_p9), 125  }
  0x22   : > { %s3134_s19 = smov (!%p457_p9), 124   ;;  %s3136_s26 = smov (!%p457_p9), 123  }
  0x23   : > { %s3172_s6 = sld [smem:[#allocation23_spill]] (!%p457_p9)  ;;  %s3146_s27 = smov (!%p457_p9), 5  }
  0x24   : > { %s3175_s7 = sld [smem:[#allocation24_spill]] (!%p457_p9) }
  0x25   : > { %v2037_v1 = vld [vmem:[%s3167_s1 + $0x14] sm:$0xff]   ;;  %v2033_v2 = vld [vmem:[%s3167_s1 + $0x4] sm:$0xff]   ;;  %v2442_v3 = vmov 0   ;;  %v2035_v8 = vld [vmem:[%s3167_s1 + $0xc] sm:$0xff]   ;;  %s523_s16 = scalar_select %p522_p10, %s2562_s10, 1  ;;  %vm585_vm0 = vcmask 1031168  }
  0x26   : > { %2231 = vset.pattern.permute.xlu1 %v2442_v3  ;;  %2220 = vset.pattern.permute.xlu0 %v2442_v3  ;;  %v637_v4 = vunpack.c.l.bf16 %v2037_v1  ;;  %v659_v5 = vunpack.c.h.bf16 %v2037_v1  ;;  %v549_v6 = vunpack.c.l.bf16 %v2033_v2  ;;  %v571_v7 = vunpack.c.h.bf16 %v2033_v2  ;;  %v2039_v15 = vld [vmem:[%s3167_s1 + $0x1c] sm:$0xff]   ;;  %v2041_v19 = vld [vmem:[%s3167_s1 + $0x24] sm:$0xff]   ;;  %v2043_v23 = vld [vmem:[%s3167_s1 + $0x2c] sm:$0xff]   ;;  %s3177_s2 = sld [smem:[#allocation19_spill]] }
  0x27   : > { %2257 = vset.pattern.permute.xlu2 %v2442_v3  ;;  %s2144_s17 = smul.u32 3, %s523_s16  ;;  %v593_v11 = vunpack.c.l.bf16 %v2035_v8  ;;  %v615_v12 = vunpack.c.h.bf16 %v2035_v8  ;;  %s3132_s16 = smov 127   ;;  %v681_v16 = vunpack.c.l.bf16 %v2039_v15  ;;  %v701_v17 = vunpack.c.h.bf16 %v2039_v15  ;;  %v2045_v24 = vld [vmem:[%s3167_s1 + $0x34] sm:$0xff]   ;;  %v528_v31 = vld [vmem:[%s3167_s1] sm:$0xf] }
  0x28   : > { %v2232_v9 = vpack.i.bf16 %v659_v5, %v637_v4  ;;  %v2221_v10 = vpack.i.bf16 %v571_v7, %v549_v6  ;;  %v725_v20 = vunpack.c.l.bf16 %v2041_v19  ;;  %v749_v21 = vunpack.c.h.bf16 %v2041_v19  ;;  %s3141_s1 = smov 2   ;;  %s3182_s8 = sld [smem:[#allocation25_spill]] }
  0x29   : > { %s525_s24 = scalar_lea.vmem %s3168_s0, %s2144_s17  ;;  %v2226_v14 = vpack.i.bf16 %v615_v12, %v593_v11  ;;  %v2237_v18 = vpack.i.bf16 %v701_v17, %v681_v16  ;;  %v773_v25 = vunpack.c.l.bf16 %v2043_v23  ;;  %v797_v26 = vunpack.c.h.bf16 %v2043_v23  ;;  %s2449_s17 = smov 121  }
  0x2a   : > { %2233 = vperm.xlu1 %2231, %v2232_v9   ;;  %2222 = vperm.xlu0 %2220, %v2221_v10   ;;  %v2608_v13 = vld [vmem:[%s525_s24] sm:$0x7]  ;;  %v2242_v22 = vpack.i.bf16 %v749_v21, %v725_v20  ;;  %s2448_s24 = smov 122   ;;  %v821_v27 = vunpack.c.l.bf16 %v2045_v24  ;;  %v845_v28 = vunpack.c.h.bf16 %v2045_v24  ;;  %v529_v32 = vunpack.c.l.bf16 %v528_v31  ;;  %s3173_s0 = smov 3  }
  0x2b   : > { %726 = vrot.lane.b32.xlu2 %v2608_v13, %s3128_s28  ;;  %v2247_v29 = vpack.i.bf16 %v797_v26, %v773_v25  ;;  %v530_v33 = vunpack.c.l.bf16 %v2608_v13  ;;  %s3171_s28 = smov 125   ;;  %vm563_vm1 = vcmask 1039360   ;;  %v683_v63 = vrot.slane %v2608_v13, 1  ;;  %s3183_s3 = sld [smem:[#allocation20_spill]] }
  0x2c   : > { %v2252_v30 = vpack.i.bf16 %v845_v28, %v821_v27  ;;  %vm629_vm2 = vcmask 1014784   ;;  %vm651_vm3 = vcmask 1006592   ;;  %vm607_vm4 = vcmask 1022976   ;;  %s3184_s9 = sld [smem:[#allocation26_spill]] }
  0x2d   : > { %v537_v34 = vperm.slane %v530_v33, 0  ;;  %v538_v35 = vperm.slane %v530_v33, 2  ;;  %v685_v6 = vunpack.c.l.bf16 %v683_v63  ;;  %vm850_vm5 = vcmask 990208   ;;  %s3185_s4 = sld [smem:[#allocation21_spill]] }
  0x2e   : > { %vm673_vm6 = vcmask 998400   ;;  %vm887_vm9 = vcmask 56320   ;;  %vm905_vm11 = vcmask 31744   ;;  %vm911_vm12 = vcmask 1043456   ;;  %s3186_s5 = sld [smem:[#allocation22_spill]] }
  0x2f   : > { %v2640_v36 = vperm.slane %v537_v34, 0  ;;  %v2642_v37 = vperm.slane %v538_v35, 0  ;;  %v691_v24 = vperm.slane %v685_v6, 0  ;;  %vm907_vm13 = vcmask 64512   ;;  %s3187_s12 = sld [smem:[#allocation27_spill]] }
  0x30   : > { %vm932_vm14 = vcmask 39936   ;;  %vm959_vm15 = vcmask 23552  }
  0x32   : > { %2227 = vperm.xlu0 %2220, %v2226_v14   ;;  %702 = vrot.lane.b32.xlu1 %v2608_v13, %s3132_s16  ;;  %s3169_s16 = smov 127  }
  0x33   : > { %750 = vrot.lane.b32.xlu2 %v2608_v13, %s3130_s18  ;;  %s3170_s18 = smov 126  }
  0x3a   : > { %2238 = vperm.xlu0 %2220, %v2237_v18   ;;  %774 = vrot.lane.b32.xlu1 %v2608_v13, %s3134_s19 }
  0x3b   : > { %798 = vrot.lane.b32.xlu2 %v2608_v13, %s3136_s26 }
  0x42   : > { %2243 = vperm.xlu0 %2220, %v2242_v22   ;;  %822 = vrot.lane.b32.xlu1 %v2608_v13, %s2448_s24 }
  0x43   : > { %846 = vrot.lane.b32.xlu2 %v2608_v13, %s2449_s17 }
  0x4a   : > { %2248 = vperm.xlu0 %2220, %v2247_v29   ;;  %2253 = vperm.xlu1 %2231, %v2252_v30  }
  0x4b   : > { %533 = vperm.xlu2 %2257, %v529_v32  }
  0x85   : > { %v727_v44 = vpop.permute.xlu2 %726 }
  0x86   : > { %v728_v57 = vrot.slane %v727_v44, 1  ;;  %v729_v58 = vrot.slane %v727_v44, 2 }
  0x88   : > { %v731_v1 = vsel %vm585_vm0, %v728_v57, %v729_v58 }
  0x89   : > { %v733_v8 = vunpack.c.l.bf16 %v731_v1 }
  0x8b   : > { %v739_v22 = vperm.slane %v733_v8, 0 }
  0x8d   : > { %v751_v52 = vpop.permute.xlu2 %750 }
  0x8e   : > { %v752_v17 = vrot.slane %v751_v52, 1  ;;  %v753_v18 = vrot.slane %v751_v52, 2 }
  0x90   : > { %v755_v27 = vsel %vm607_vm4, %v752_v17, %v753_v18 }
  0x91   : > { %v757_v35 = vunpack.c.l.bf16 %v755_v27 }
  0x95   : > { %v799_v2 = vpop.permute.xlu2 %798 }
  0x96   : > { %v800_v12 = vrot.slane %v799_v2, 1  ;;  %v801_v16 = vrot.slane %v799_v2, 2 }
  0x98   : > { %v803_v26 = vsel %vm651_vm3, %v800_v12, %v801_v16 }
  0x99   : > { %v805_v33 = vunpack.c.l.bf16 %v803_v26 }
  0x9c   : > { %v2223_v38 = vpop.permute.xlu0 %2222  ;;  %v2234_v45 = vpop.permute.xlu1 %2233 }
  0x9d   : > { %v2225_v39 = vunpack.i.h.bf16 %v2223_v38  ;;  %v2224_v40 = vunpack.i.l.bf16 %v2223_v38  ;;  %v2235_v51 = vunpack.i.l.bf16 %v2234_v45  ;;  %v2236_v0 = vunpack.i.h.bf16 %v2234_v45  ;;  %v847_v28 = vpop.permute.xlu2 %846 }
  0x9e   : > { %v848_v38 = vrot.slane %v847_v28, 1 }
  0x9f   : > { %v555_v41 = vmul.f32 %v2224_v40, %v2640_v36  ;;  %v556_v42 = vmul.f32 %v2224_v40, %v2642_v37  ;;  %v577_v43 = vmul.f32 %v2225_v39, %v2640_v36  ;;  %v578_v50 = vmul.f32 %v2225_v39, %v2642_v37 }
  0xa0   : > { %v643_v56 = vmul.f32 %v2235_v51, %v2640_v36  ;;  %v665_v9 = vmul.f32 %v2236_v0, %v2640_v36  ;;  %v666_v10 = vmul.f32 %v2236_v0, %v2642_v37  ;;  %v644_v13 = vmul.f32 %v2235_v51, %v2642_v37 }
  0xa1   : > { %561 = vrot.lane.b32.xlu1 %v556_v42, %s3169_s16  ;;  %581 = vrot.lane.b32.xlu2 %v577_v43, %s3170_s18  ;;  %v849_v39 = vrot.slane %v847_v28, 2 }
  0xa2   : > { %559 = vrot.lane.b32.xlu0 %v555_v41, %s3169_s16 }
  0xa4   : > { %v2228_v46 = vpop.permute.xlu0 %2227  ;;  %v703_v53 = vpop.permute.xlu1 %702 }
  0xa5   : > { %v2229_v47 = vunpack.i.l.bf16 %v2228_v46  ;;  %v2230_v54 = vunpack.i.h.bf16 %v2228_v46  ;;  %v704_v61 = vrot.slane %v703_v53, 1  ;;  %v705_v62 = vrot.slane %v703_v53, 2  ;;  %v534_v0 = vpop.permute.xlu2 %533 }
  0xa6   : > { %v811_v46 = vperm.slane %v805_v33, 0 }
  0xa7   : > { %v599_v48 = vmul.f32 %v2229_v47, %v2640_v36  ;;  %v600_v49 = vmul.f32 %v2229_v47, %v2642_v37  ;;  %v622_v59 = vmul.f32 %v2230_v54, %v2642_v37  ;;  %v621_v60 = vmul.f32 %v2230_v54, %v2640_v36 }
  0xa8   : > { %v707_v4 = vsel %vm563_vm1, %v704_v61, %v705_v62  ;;  %v867_v61 = vld [vmem:[%s3172_s6] sm:$0xff]  ;;  %s3144_s6 = smov 1  }
  0xa9   : > { %603 = vrot.lane.b32.xlu1 %v599_v48, %s3171_s28  ;;  %605 = vrot.lane.b32.xlu2 %v600_v49, %s3171_s28  ;;  %v709_v11 = vunpack.c.l.bf16 %v707_v4  ;;  %v763_v48 = vperm.slane %v757_v35, 0  ;;  %v851_v49 = vsel %vm850_vm5, %v848_v38, %v849_v39  ;;  %vm987_vm5 = vcmask 15360  }
  0xaa   : > { %583 = vrot.lane.b32.xlu0 %v578_v50, %s3170_s18  ;;  %v853_v53 = vunpack.c.l.bf16 %v851_v49 }
  0xab   : > { %v715_v20 = vperm.slane %v709_v11, 0  ;;  %v544_v11 = vmul.f32 %v2642_v37, %v534_v0 }
  0xac   : > { %v2239_v55 = vpop.permute.xlu0 %2238  ;;  %v775_v5 = vpop.permute.xlu1 %774  ;;  %v859_v57 = vperm.slane %v853_v53, 0 }
  0xad   : > { %v776_v14 = vrot.slane %v775_v5, 1  ;;  %v777_v15 = vrot.slane %v775_v5, 2  ;;  %v2241_v19 = vunpack.i.h.bf16 %v2239_v55  ;;  %v2240_v23 = vunpack.i.l.bf16 %v2239_v55 }
  0xaf   : > { %v779_v25 = vsel %vm629_vm2, %v776_v14, %v777_v15  ;;  %v716_v30 = vmul.f32 %v2241_v19, %v715_v20  ;;  %v692_v34 = vmul.f32 %v2240_v23, %v691_v24 }
  0xb0   : > { %v781_v32 = vunpack.c.l.bf16 %v779_v25 }
  0xb1   : > { %627 = vrot.lane.b32.xlu1 %v622_v59, %s3134_s19  ;;  %647 = vrot.lane.b32.xlu2 %v643_v56, %s3136_s26 }
  0xb2   : > { %625 = vrot.lane.b32.xlu0 %v621_v60, %s3134_s19  ;;  %v787_v45 = vperm.slane %v781_v32, 0  ;;  %s3138_s19 = smov 3  }
  0xb4   : > { %v2244_v7 = vpop.permute.xlu0 %2243  ;;  %v823_v29 = vpop.permute.xlu1 %822 }
  0xb5   : > { %v2245_v21 = vunpack.i.l.bf16 %v2244_v7  ;;  %v824_v41 = vrot.slane %v823_v29, 1  ;;  %v825_v42 = vrot.slane %v823_v29, 2  ;;  %v2246_v47 = vunpack.i.h.bf16 %v2244_v7 }
  0xb7   : > { %v740_v31 = vmul.f32 %v2245_v21, %v739_v22  ;;  %v827_v50 = vsel %vm673_vm6, %v824_v41, %v825_v42  ;;  %v764_v54 = vmul.f32 %v2246_v47, %v763_v48 }
  0xb8   : > { %v829_v55 = vunpack.c.l.bf16 %v827_v50 }
  0xb9   : > { %669 = vrot.lane.b32.xlu1 %v665_v9, %s2448_s24  ;;  %671 = vrot.lane.b32.xlu2 %v666_v10, %s2448_s24  ;;  %v543_v10 = vmul.f32 %v2640_v36, %v534_v0  ;;  %s3143_s24 = smov 4  }
  0xba   : > { %649 = vrot.lane.b32.xlu0 %v644_v13, %s3136_s26  ;;  %v835_v59 = vperm.slane %v829_v55, 0  ;;  %s2701_s26 = sand.u32 1, %s2432_s21   ;;  %s3181_s21 = smov 2  }
  0xbc   : > { %v2249_v40 = vpop.permute.xlu0 %2248  ;;  %v2254_v56 = vpop.permute.xlu1 %2253 }
  0xbd   : > { %v2251_v43 = vunpack.i.h.bf16 %v2249_v40  ;;  %v2250_v44 = vunpack.i.l.bf16 %v2249_v40  ;;  %v2256_v58 = vunpack.i.h.bf16 %v2254_v56  ;;  %v2255_v60 = vunpack.i.l.bf16 %v2254_v56 }
  0xbf   : > { %v788_v51 = vmul.f32 %v2250_v44, %v787_v45  ;;  %v812_v52 = vmul.f32 %v2251_v43, %v811_v46  ;;  %v860_v62 = vmul.f32 %v2256_v58, %v859_v57  ;;  %v836_v63 = vmul.f32 %v2255_v60, %v835_v59 }
  0xc1   : > { %718 = vrot.lane.b32.xlu1 %v716_v30, %s2449_s17  ;;  %742 = vrot.lane.b32.xlu2 %v740_v31, %s2449_s17 }
  0xc2   : > { %694 = vrot.lane.b32.xlu0 %v692_v34, %s2449_s17 }
  0xc9   : > { %790 = vrot.lane.b32.xlu1 %v788_v51, %s2449_s17  ;;  %814 = vrot.lane.b32.xlu2 %v812_v52, %s2449_s17 }
  0xca   : > { %766 = vrot.lane.b32.xlu0 %v764_v54, %s2449_s17 }
  0xd1   : > { %862 = vrot.lane.b32.xlu1 %v860_v62, %s2449_s17  ;;  %870 = vperm.xlu2 %2257, %v867_v61  }
  0xd2   : > { %838 = vrot.lane.b32.xlu0 %v836_v63, %s2449_s17  ;;  %s2451_s17 = smov 7  }
  0xd9   : > { %955 = vrot.lane.b32.xlu2 %v2442_v3, %s3138_s19  ;;  %s2706_s19 = sshll.u32 %s2701_s26, 3 }
  0xfb   : > { %v582_v1 = vpop.permute.xlu2 %581 }
 0x103   : > { %v606_v5 = vpop.permute.xlu2 %605 }
 0x10b   : > { %v648_v8 = vpop.permute.xlu2 %647 }
 0x113   : > { %v562_v2 = vpop.permute.xlu1 %561  ;;  %v672_v19 = vpop.permute.xlu2 %671 }
 0x114   : > { %v560_v4 = vpop.permute.xlu0 %559  ;;  %v568_v15 = vadd.f32 %v562_v2, %v544_v11 }
 0x115   : > { %v564_v9 = vsel %vm563_vm1, %v560_v4, %v562_v2 }
 0x116   : > { %v567_v16 = vadd.f32 %v564_v9, %v543_v10  ;;  %v1194_v9 = vld [vmem:[%s3175_s7] sm:$0xff]  ;;  %s3179_s7 = smov 4  }
 0x11b   : > { %v604_v6 = vpop.permute.xlu1 %603  ;;  %v743_v33 = vpop.permute.xlu2 %742 }
 0x11c   : > { %v584_v7 = vpop.permute.xlu0 %583  ;;  %v608_v20 = vsel %vm607_vm4, %v604_v6, %v606_v5 }
 0x11d   : > { %v586_v13 = vsel %vm585_vm0, %v582_v1, %v584_v7  ;;  %v590_v18 = vadd.f32 %v584_v7, %v568_v15  ;;  %v891_v1 = vlaneseq  ;;  %v2047_v15 = vld [vmem:[%s3177_s2 + $0x4] sm:$0xf] }
 0x11e   : > { %v589_v17 = vadd.f32 %v586_v13, %v567_v16 }
 0x11f   : > { %v612_v22 = vadd.f32 %v606_v5, %v590_v18  ;;  %v2703_v2 = vand.u32 127, %v891_v1 }
 0x120   : > { %v611_v23 = vadd.f32 %v608_v20, %v589_v17 }
 0x121   : > { %vm893_vm10 = vcmp.lt.s32.totalorder %v2703_v2, 64 }
 0x123   : > { %v628_v12 = vpop.permute.xlu1 %627  ;;  %v815_v47 = vpop.permute.xlu2 %814 }
 0x124   : > { %v626_v14 = vpop.permute.xlu0 %625  ;;  %v634_v36 = vadd.f32 %v628_v12, %v612_v22 }
 0x125   : > { %v630_v21 = vsel %vm629_vm2, %v626_v14, %v628_v12 }
 0x126   : > { %v633_v26 = vadd.f32 %v630_v21, %v611_v23 }
 0x12b   : > { %v670_v24 = vpop.permute.xlu1 %669  ;;  %v871_v58 = vpop.permute.xlu2 %870 }
 0x12c   : > { %v650_v25 = vpop.permute.xlu0 %649  ;;  %v674_v29 = vsel %vm673_vm6, %v670_v24, %v672_v19  ;;  %v896_v24 = vld [vmem:[%s3177_s2] sm:$0xf]  ;;  %vm1015_vm6 = vcmask 7168  }
 0x12d   : > { %v652_v37 = vsel %vm651_vm3, %v648_v8, %v650_v25  ;;  %v656_v28 = vadd.f32 %v650_v25, %v634_v36  ;;  %v2050_v36 = vld [vmem:[%s3177_s2 + $0x8] sm:$0xf] }
 0x12e   : > { %v655_v27 = vadd.f32 %v652_v37, %v633_v26 }
 0x12f   : > { %v678_v31 = vadd.f32 %v672_v19, %v656_v28 }
 0x130   : > { %v677_v32 = vadd.f32 %v674_v29, %v655_v27 }
 0x133   : > { %v719_v30 = vpop.permute.xlu1 %718  ;;  %v2741_v10 = vpop.permute.xlu2 %955 }
 0x134   : > { %v695_v34 = vpop.permute.xlu0 %694 }
 0x135   : > { %v697_v35 = vadd.f32 %v695_v34, %v677_v32  ;;  %v698_v38 = vadd.f32 %v695_v34, %v678_v31  ;;  %v2052_v31 = vld [vmem:[%s3177_s2 + $0xc] sm:$0xf] }
 0x137   : > { %v721_v39 = vadd.f32 %v719_v30, %v697_v35  ;;  %v722_v40 = vadd.f32 %v719_v30, %v698_v38 }
 0x139   : > { %v746_v41 = vadd.f32 %v743_v33, %v722_v40  ;;  %v745_v42 = vadd.f32 %v743_v33, %v721_v39  ;;  %v2056_v39 = vld [vmem:[%s3177_s2 + $0x14] sm:$0xf]  ;;  %v2054_v40 = vld [vmem:[%s3177_s2 + $0x10] sm:$0xf] }
 0x13b   : > { %v791_v43 = vpop.permute.xlu1 %790 }
 0x13c   : > { %v767_v44 = vpop.permute.xlu0 %766 }
 0x13d   : > { %v769_v45 = vadd.f32 %v767_v44, %v745_v42  ;;  %v770_v46 = vadd.f32 %v767_v44, %v746_v41  ;;  %v2058_v41 = vld [vmem:[%s3177_s2 + $0x18] sm:$0xf] }
 0x13f   : > { %v793_v48 = vadd.f32 %v791_v43, %v769_v45  ;;  %v794_v49 = vadd.f32 %v791_v43, %v770_v46 }
 0x141   : > { %v818_v50 = vadd.f32 %v815_v47, %v794_v49  ;;  %v817_v51 = vadd.f32 %v815_v47, %v793_v48  ;;  %v2060_v49 = vld [vmem:[%s3177_s2 + $0x1c] sm:$0xf] }
 0x143   : > { %v863_v55 = vpop.permute.xlu1 %862 }
 0x144   : > { %v839_v52 = vpop.permute.xlu0 %838 }
 0x145   : > { %v841_v53 = vadd.f32 %v839_v52, %v817_v51  ;;  %v842_v54 = vadd.f32 %v839_v52, %v818_v50 }
 0x147   : > { %v865_v56 = vadd.f32 %v863_v55, %v841_v53  ;;  %v866_v57 = vadd.f32 %v863_v55, %v842_v54  ;;  %v2062_v54 = vld [vmem:[%s3177_s2 + $0x20] sm:$0xf]  ;;  %v2066_v55 = vld [vmem:[%s3177_s2 + $0x28] sm:$0xf] }
 0x149   : > { %v873_v59 = vadd.f32 %v871_v58, %v865_v56  ;;  %v874_v60 = vadd.f32 %v871_v58, %v866_v57 }
 0x14b   : > { %vm876_vm7 = vcmp.ge.f32.partialorder %v874_v60, 0.0  ;;  %v878_v61 = vmul.f32 0.2, %v874_v60  ;;  %vm875_vm8 = vcmp.ge.f32.partialorder %v873_v59, 0.0  ;;  %v877_v62 = vmul.f32 0.2, %v873_v59 }
 0x14d   : > { %v880_v63 = vsel %vm876_vm7, %v874_v60, %v878_v61  ;;  %v879_v0 = vsel %vm875_vm8, %v873_v59, %v877_v62  ;;  %v2064_v60 = vld [vmem:[%s3177_s2 + $0x24] sm:$0xf]  ;;  %s3188_s2 = scalar_lea.vmem [#allocation5], %s2706_s19 }
 0x14e   : > { %885 = vrot.lane.b32.xlu1 %v880_v63, %s2451_s17  ;;  %883 = vrot.lane.b32.xlu0 %v879_v0, %s2451_s17  ;;  %s3140_s17 = scalar_lea.vmem [#allocation3], %s2706_s19 }
 0x156   : > { %901 = vrot.lane.b32.xlu1 %v2442_v3, %s3143_s24  ;;  %928 = vrot.lane.b32.xlu0 %v2442_v3, %s3146_s27 }
 0x1c0   : > { %v886_v4 = vpop.permute.xlu1 %885  ;;  %v884_v5 = vpop.permute.xlu0 %883 }
 0x1c1   : > { %v888_v6 = vsel %vm887_vm9, %v884_v5, %v886_v4 }
 0x1c2   : > { %890 = vst [vmem:[%s3140_s17] sm:$0xff] %v888_v6  ;;  %v894_v7 = vsel %vm893_vm10, %v888_v6, 0.0  ;;  %s3174_s17 = smov 123  }
 0x1c3   : > { %v895_v8 = vpack.c.bf16 %v894_v7, %v894_v7 }
 0x1c5   : > { %930 = vrot.lane.b32.xlu1 %v895_v8, %s3146_s27  ;;  %903 = vrot.lane.b32.xlu2 %v895_v8, %s3143_s24  ;;  %v1043_v23 = vsel %vm911_vm12, %v895_v8, 0  ;;  %s3178_s24 = smov 5   ;;  %s3180_s27 = smov 1  }
 0x1c6   : > { %957 = vrot.lane.b32.xlu0 %v895_v8, %s3173_s0 }
 0x1c8   : > { %v2743_v11 = vpop.permute.xlu1 %901 }
 0x1cd   : > { %1061 = vrot.lane.b32.xlu1 %v895_v8, %s3169_s16  ;;  %983 = vrot.lane.b32.xlu2 %v2442_v3, %s3141_s1 }
 0x1ce   : > { %985 = vrot.lane.b32.xlu0 %v895_v8, %s3141_s1  ;;  %s3149_s1 = scalar_lea.vmem [#allocation5], %s2706_s19 }
 0x1d5   : > { %1013 = vrot.lane.b32.xlu1 %v895_v8, %s3144_s6  ;;  %1063 = vrot.lane.b32.xlu2 %v2442_v3, %s3169_s16 }
 0x1d6   : > { %1011 = vrot.lane.b32.xlu0 %v2442_v3, %s3144_s6  ;;  %s3176_s6 = smov 124  }
 0x1dd   : > { %1169 = vrot.lane.b32.xlu1 %v895_v8, %s3174_s17  ;;  %1088 = vrot.lane.b32.xlu2 %v895_v8, %s3170_s18 }
 0x1de   : > { %1090 = vrot.lane.b32.xlu0 %v2442_v3, %s3170_s18 }
 0x1e5   : > { %1117 = vrot.lane.b32.xlu1 %v2442_v3, %s3171_s28  ;;  %1171 = vrot.lane.b32.xlu2 %v2442_v3, %s3174_s17 }
 0x1e6   : > { %1115 = vrot.lane.b32.xlu0 %v895_v8, %s3171_s28 }
 0x1ed   : > { %1197 = vperm.xlu1 %2231, %v1194_v9   ;;  %1142 = vrot.lane.b32.xlu2 %v895_v8, %s3176_s6 }
 0x1ee   : > { %1144 = vrot.lane.b32.xlu0 %v2442_v3, %s3176_s6  ;;  %v2752_v3 = vpop.permute.xlu0 %928 }
 0x21f   : > { %v904_v12 = vpop.permute.xlu2 %903 }
 0x220   : > { %v906_v13 = vsel %vm905_vm11, %v2743_v11, %v904_v12 }
 0x221   : > { %v913_v14 = vsel %vm911_vm12, %v906_v13, 0 }
 0x222   : > { %922 = vmatpush.bf16.msra.mxu0 %v913_v14 }
 0x225   : > { %2048 = vmatmul.msk.bf16.vlgmr.msra.gmra.mxu0 %vm907_vm13, %v2047_v15 }
 0x227   : > { %v2754_v16 = vpop.permute.xlu2 %983 }
 0x22f   : > { %v2766_v25 = vpop.permute.xlu2 %1063 }
 0x237   : > { %v931_v17 = vpop.permute.xlu1 %930  ;;  %v1089_v32 = vpop.permute.xlu2 %1088 }
 0x238   : > { %v958_v18 = vpop.permute.xlu0 %957  ;;  %v933_v19 = vsel %vm932_vm14, %v2752_v3, %v931_v17 }
 0x239   : > { %v938_v20 = vsel %vm911_vm12, %v933_v19, 0  ;;  %v960_v21 = vsel %vm959_vm15, %v2741_v10, %v958_v18 }
 0x23a   : > { %947 = vmatpush.bf16.msra.mxu1 %v938_v20  ;;  %v965_v22 = vsel %vm911_vm12, %v960_v21, 0 }
 0x23b   : > { %974 = vmatpush.bf16.msra.mxu2 %v965_v22 }
 0x23d   : > { %2049 = vmatmul.msk.bf16.vlgmr.msra.gmra.mxu1 %vm907_vm13, %v896_v24 }
 0x23e   : > { %1052 = vmatpush.bf16.msrb.mxu1 %v1043_v23  ;;  %2051 = vmatmul.msk.bf16.vlgmr.msra.gmra.mxu2 %vm907_vm13, %v2050_v36 }
 0x23f   : > { %v1062_v26 = vpop.permute.xlu1 %1061  ;;  %v2800_v42 = vpop.permute.xlu2 %1171 }
 0x240   : > { %v986_v37 = vpop.permute.xlu0 %985  ;;  %v1065_v27 = vsel %vm563_vm1, %v1062_v26, %v2766_v25 }
 0x241   : > { %v988_v28 = vsel %vm987_vm5, %v2754_v16, %v986_v37  ;;  %v1070_v29 = vsel %vm911_vm12, %v1065_v27, 0 }
 0x242   : > { %v993_v30 = vsel %vm911_vm12, %v988_v28, 0  ;;  %1079 = vmatpush.bf16.msrb.mxu2 %v1070_v29 }
 0x243   : > { %1002 = vmatpush.bf16.msra.mxu3 %v993_v30 }
 0x246   : > { %2053 = vmatmul.msk.bf16.vlgmr.msra.gmra.mxu3 %vm907_vm13, %v2052_v31 }
 0x247   : > { %v1014_v33 = vpop.permute.xlu1 %1013  ;;  %v1143_v56 = vpop.permute.xlu2 %1142 }
 0x248   : > { %v2783_v34 = vpop.permute.xlu0 %1011 }
 0x249   : > { %v1016_v35 = vsel %vm1015_vm6, %v2783_v34, %v1014_v33 }
 0x24a   : > { %v1021_v38 = vsel %vm911_vm12, %v1016_v35, 0 }
 0x24b   : > { %1030 = vmatpush.bf16.msrb.mxu0 %v1021_v38 }
 0x24d   : > { %2057 = vmatmul.msk.bf16.vlgmr.msrb.gmra.mxu1 %vm907_vm13, %v2056_v39 }
 0x24e   : > { %2055 = vmatmul.msk.bf16.vlgmr.msrb.gmra.mxu0 %vm907_vm13, %v2054_v40  ;;  %2059 = vmatmul.msk.bf16.vlgmr.msrb.gmra.mxu2 %vm907_vm13, %v2058_v41 }
 0x24f   : > { %v1170_v43 = vpop.permute.xlu1 %1169 }
 0x250   : > { %v1173_v44 = vsel %vm651_vm3, %v1170_v43, %v2800_v42  ;;  %v2804_v45 = vpop.permute.xlu0 %1090  ;;  %v1477_v43 = vld [vmem:[%s3182_s8] sm:$0xff] }
 0x251   : > { %v1178_v46 = vsel %vm911_vm12, %v1173_v44, 0  ;;  %v1092_v47 = vsel %vm585_vm0, %v1089_v32, %v2804_v45 }
 0x252   : > { %v1097_v48 = vsel %vm911_vm12, %v1092_v47, 0  ;;  %1187 = vmatpush.bf16.msra.mxu2 %v1178_v46 }
 0x253   : > { %1106 = vmatpush.bf16.msrb.mxu3 %v1097_v48  ;;  %v2068_v48 = vld [vmem:[%s3183_s3 + $0x4] sm:$0xf] }
 0x256   : > { %2061 = vmatmul.msk.bf16.vlgmr.msrb.gmra.mxu3 %vm907_vm13, %v2060_v49 }
 0x257   : > { %v2814_v50 = vpop.permute.xlu1 %1117 }
 0x258   : > { %v1116_v51 = vpop.permute.xlu0 %1115 }
 0x259   : > { %v1119_v52 = vsel %vm607_vm4, %v1116_v51, %v2814_v50 }
 0x25a   : > { %v1124_v53 = vsel %vm911_vm12, %v1119_v52, 0 }
 0x25b   : > { %1133 = vmatpush.bf16.msra.mxu0 %v1124_v53 }
 0x25e   : > { %2063 = vmatmul.msk.bf16.vlgmr.msra.gmra.mxu0 %vm907_vm13, %v2062_v54  ;;  %2067 = vmatmul.msk.bf16.vlgmr.msra.gmra.mxu2 %vm907_vm13, %v2066_v55 }
 0x25f   : > { %v1198_v31 = vpop.permute.xlu1 %1197 }
 0x260   : > { %v2827_v57 = vpop.permute.xlu0 %1144 }
 0x261   : > { %v1146_v58 = vsel %vm629_vm2, %v1143_v56, %v2827_v57 }
 0x262   : > { %v1151_v59 = vsel %vm911_vm12, %v1146_v58, 0 }
 0x263   : > { %1160 = vmatpush.bf16.msra.mxu1 %v1151_v59 }
 0x266   : > { %2065 = vmatmul.msk.bf16.vlgmr.msra.gmra.mxu1 %vm907_vm13, %v2064_v60 }
 0x2a2   : > { %v924_v61 = vpop.f32.mrf.mxu0 }
 0x2aa   : > { %v926_v62 = vpop.f32.mrf.mxu0 }
 0x2ba   : > { %v949_v63 = vpop.f32.mrf.mxu1 }
 0x2bb   : > { %v950_v8 = vadd.f32 %v949_v63, %v924_v61 }
 0x2c1   : > { %v976_v0 = vpop.f32.mrf.mxu2 }
 0x2c2   : > { %v951_v1 = vpop.f32.mrf.mxu1  ;;  %v980_v9 = vadd.f32 %v976_v0, %v950_v8  ;;  %v1207_v0 = vld [vmem:[%s3183_s3] sm:$0xf] }
 0x2c3   : > { %v2071_v1 = vld [vmem:[%s3183_s3 + $0x8] sm:$0xf] }
 0x2c9   : > { %v978_v4 = vpop.f32.mrf.mxu2  ;;  %v1004_v5 = vpop.f32.mrf.mxu3 }
 0x2ca   : > { %v1054_v6 = vpop.f32.mrf.mxu1  ;;  %v1008_v14 = vadd.f32 %v1004_v5, %v980_v9 }
 0x2cb   : > { %v1032_v7 = vpop.f32.mrf.mxu0 }
 0x2cc   : > { %v1036_v18 = vadd.f32 %v1032_v7, %v1008_v14 }
 0x2ce   : > { %v1058_v21 = vadd.f32 %v1054_v6, %v1036_v18 }
 0x2d1   : > { %v1006_v12 = vpop.f32.mrf.mxu3  ;;  %v1081_v13 = vpop.f32.mrf.mxu2 }
 0x2d2   : > { %v1056_v15 = vpop.f32.mrf.mxu1  ;;  %v1085_v23 = vadd.f32 %v1081_v13, %v1058_v21  ;;  %v2077_v21 = vld [vmem:[%s3183_s3 + $0x14] sm:$0xf] }
 0x2d3   : > { %v1034_v17 = vpop.f32.mrf.mxu0 }
 0x2d9   : > { %v1083_v19 = vpop.f32.mrf.mxu2  ;;  %v1108_v20 = vpop.f32.mrf.mxu3 }
 0x2da   : > { %v1112_v24 = vadd.f32 %v1108_v20, %v1085_v23  ;;  %v2087_v23 = vld [vmem:[%s3183_s3 + $0x28] sm:$0xf] }
 0x2db   : > { %v1135_v22 = vpop.f32.mrf.mxu0 }
 0x2dc   : > { %v1139_v37 = vadd.f32 %v1135_v22, %v1112_v24  ;;  %v2079_v22 = vld [vmem:[%s3183_s3 + $0x18] sm:$0xf] }
 0x2e1   : > { %v1110_v36 = vpop.f32.mrf.mxu3  ;;  %v1189_v26 = vpop.f32.mrf.mxu2 }
 0x2e3   : > { %v1137_v27 = vpop.f32.mrf.mxu0  ;;  %v1162_v28 = vpop.f32.mrf.mxu1 }
 0x2e4   : > { %v1166_v29 = vadd.f32 %v1162_v28, %v1139_v37 }
 0x2e6   : > { %v1193_v30 = vadd.f32 %v1189_v26, %v1166_v29 }
 0x2e8   : > { %v1200_v32 = vadd.f32 %v1198_v31, %v1193_v30 }
 0x2e9   : > { %v1191_v33 = vpop.f32.mrf.mxu2 }
 0x2ea   : > { %vm1201_vm7 = vcmp.ge.f32.partialorder %v1200_v32, 0.0  ;;  %v1202_v35 = vmul.f32 0.2, %v1200_v32 }
 0x2eb   : > { %v1164_v38 = vpop.f32.mrf.mxu1 }
 0x2ec   : > { %v1203_v39 = vsel %vm1201_vm7, %v1200_v32, %v1202_v35 }
 0x2ed   : > { %v1205_v40 = vsel %vm893_vm10, %v1203_v39, 0.0  ;;  %1204 = vst [vmem:[%s3149_s1] sm:$0xff] %v1203_v39 }
 0x2ee   : > { %v1206_v41 = vpack.c.bf16 %v1205_v40, %v1205_v40 }
 0x2f0   : > { %1257 = vrot.lane.b32.xlu1 %v1206_v41, %s3173_s0  ;;  %1233 = vrot.lane.b32.xlu0 %v1206_v41, %s3178_s24  ;;  %v1336_v63 = vsel %vm911_vm12, %v1206_v41, 0 }
 0x2f1   : > { %1211 = vrot.lane.b32.xlu2 %v1206_v41, %s3179_s7  ;;  %s3150_s7 = scalar_lea.vmem [#allocation7], %s2706_s19 }
 0x2f8   : > { %1354 = vrot.lane.b32.xlu1 %v1206_v41, %s3169_s16  ;;  %1307 = vrot.lane.b32.xlu0 %v1206_v41, %s3180_s27 }
 0x2f9   : > { %1282 = vrot.lane.b32.xlu2 %v1206_v41, %s3181_s21 }
 0x300   : > { %1429 = vrot.lane.b32.xlu1 %v1206_v41, %s3176_s6  ;;  %1404 = vrot.lane.b32.xlu0 %v1206_v41, %s3171_s28  ;;  %s3002_s6 = sshll.u32 %s2562_s10, 3  ;;  %s2143_s28 = sshll.u32 %s2562_s10, 4 }
 0x301   : > { %1379 = vrot.lane.b32.xlu2 %v1206_v41, %s3170_s18  ;;  %s1796_s1 = scalar_lea.hbm %s3187_s12, %s3002_s6 }
 0x308   : > { %1480 = vperm.xlu0 %2220, %v1477_v43  }
 0x309   : > { %1454 = vrot.lane.b32.xlu2 %v1206_v41, %s3174_s17 }
 0x34b   : > { %v1212_v44 = vpop.permute.xlu2 %1211 }
 0x34c   : > { %v1213_v46 = vsel %vm905_vm11, %v2743_v11, %v1212_v44  ;;  %v2073_v11 = vld [vmem:[%s3183_s3 + $0xc] sm:$0xf] }
 0x34d   : > { %v1218_v47 = vsel %vm911_vm12, %v1213_v46, 0 }
 0x34e   : > { %1227 = vmatpush.bf16.msra.mxu3 %v1218_v47 }
 0x351   : > { %2069 = vmatmul.msk.bf16.vlgmr.msra.gmra.mxu3 %vm907_vm13, %v2068_v48 }
 0x353   : > { %v1283_v49 = vpop.permute.xlu2 %1282 }
 0x354   : > { %v1284_v51 = vsel %vm987_vm5, %v2754_v16, %v1283_v49 }
 0x355   : > { %v1289_v52 = vsel %vm911_vm12, %v1284_v51, 0 }
 0x356   : > { %1298 = vmatpush.bf16.msrb.mxu2 %v1289_v52 }
 0x359   : > { %2074 = vmatmul.msk.bf16.vlgmr.msrb.gmra.mxu2 %vm907_vm13, %v2073_v11 }
 0x35b   : > { %v1380_v53 = vpop.permute.xlu2 %1379 }
 0x35c   : > { %v1381_v54 = vsel %vm585_vm0, %v1380_v53, %v2804_v45 }
 0x35d   : > { %v1386_v55 = vsel %vm911_vm12, %v1381_v54, 0 }
 0x35e   : > { %1395 = vmatpush.bf16.msra.mxu2 %v1386_v55 }
 0x362   : > { %v1258_v56 = vpop.permute.xlu1 %1257  ;;  %v1234_v58 = vpop.permute.xlu0 %1233 }
 0x363   : > { %v1259_v59 = vsel %vm959_vm15, %v2741_v10, %v1258_v56  ;;  %v1235_v60 = vsel %vm932_vm14, %v2752_v3, %v1234_v58  ;;  %v2081_v10 = vld [vmem:[%s3183_s3 + $0x1c] sm:$0xf]  ;;  %v1455_v3 = vpop.permute.xlu2 %1454 }
 0x364   : > { %v1264_v61 = vsel %vm911_vm12, %v1259_v59, 0  ;;  %v1240_v62 = vsel %vm911_vm12, %v1235_v60, 0  ;;  %v1456_v4 = vsel %vm651_vm3, %v1455_v3, %v2800_v42  ;;  %v2075_v42 = vld [vmem:[%s3183_s3 + $0x10] sm:$0xf] }
 0x365   : > { %1249 = vmatpush.bf16.msrb.mxu0 %v1240_v62  ;;  %1273 = vmatpush.bf16.msrb.mxu1 %v1264_v61  ;;  %v1461_v13 = vsel %vm911_vm12, %v1456_v4, 0  ;;  %v1649_v4 = vld [vmem:[%s3184_s9 + $0x8] sm:$0xff] }
 0x368   : > { %2070 = vmatmul.msk.bf16.vlgmr.msrb.gmra.mxu0 %vm907_vm13, %v1207_v0  ;;  %2072 = vmatmul.msk.bf16.vlgmr.msrb.gmra.mxu1 %vm907_vm13, %v2071_v1 }
 0x369   : > { %1345 = vmatpush.bf16.msra.mxu0 %v1336_v63  ;;  %2082 = vmatmul.msk.bf16.vlgmr.msra.gmra.mxu2 %vm907_vm13, %v2081_v10 }
 0x36a   : > { %v1355_v5 = vpop.permute.xlu1 %1354  ;;  %v1308_v6 = vpop.permute.xlu0 %1307 }
 0x36b   : > { %v1356_v7 = vsel %vm563_vm1, %v1355_v5, %v2766_v25  ;;  %v1309_v8 = vsel %vm1015_vm6, %v2783_v34, %v1308_v6  ;;  %v1648_v5 = vld [vmem:[%s3184_s9] sm:$0xff] }
 0x36c   : > { %v1361_v9 = vsel %vm911_vm12, %v1356_v7, 0  ;;  %v1314_v12 = vsel %vm911_vm12, %v1309_v8, 0  ;;  %v1743_v6 = vld [vmem:[#allocation2] sm:$0x1] }
 0x36d   : > { %1323 = vmatpush.bf16.msrb.mxu3 %v1314_v12  ;;  %1370 = vmatpush.bf16.msra.mxu1 %v1361_v9  ;;  %v2138_v12 = vld [vmem:[%s3185_s4] sm:$0xff] }
 0x370   : > { %2076 = vmatmul.msk.bf16.vlgmr.msrb.gmra.mxu3 %vm907_vm13, %v2075_v42 }
 0x371   : > { %1470 = vmatpush.bf16.msrb.mxu1 %v1461_v13  ;;  %v2140_v13 = vld [vmem:[%s3185_s4 + $0x10] sm:$0xff] }
 0x372   : > { %v1430_v14 = vpop.permute.xlu1 %1429  ;;  %v1405_v15 = vpop.permute.xlu0 %1404 }
 0x373   : > { %v1431_v17 = vsel %vm629_vm2, %v1430_v14, %v2827_v57  ;;  %v1406_v18 = vsel %vm607_vm4, %v1405_v15, %v2814_v50  ;;  %v2083_v50 = vld [vmem:[%s3183_s3 + $0x20] sm:$0xf]  ;;  %v2085_v57 = vld [vmem:[%s3183_s3 + $0x24] sm:$0xf]  ;;  %vm1683_vm4 = vcmask 130048   ;;  %s1798_s3 = sshll.u32 %s3188_s2, 4  ;;  %s1799_s3 = int_to_ptr.vmem [resolvable:$true] %s1798_s3 }
 0x374   : > { %v1436_v19 = vsel %vm911_vm12, %v1431_v17, 0  ;;  %v1411_v20 = vsel %vm911_vm12, %v1406_v18, 0 }
 0x375   : > { %1420 = vmatpush.bf16.msra.mxu3 %v1411_v20  ;;  %1445 = vmatpush.bf16.msrb.mxu0 %v1436_v19  ;;  %v2139_v19 = vld [vmem:[%s3185_s4 + $0x8] sm:$0xff] }
 0x378   : > { %2078 = vmatmul.msk.bf16.vlgmr.msra.gmra.mxu0 %vm907_vm13, %v2077_v21  ;;  %2080 = vmatmul.msk.bf16.vlgmr.msra.gmra.mxu1 %vm907_vm13, %v2079_v22  ;;  %v2141_v22 = vld [vmem:[%s3185_s4 + $0x18] sm:$0xff] }
 0x37a   : > { %v1481_v58 = vpop.permute.xlu0 %1480 }
 0x380   : > { %2084 = vmatmul.msk.bf16.vlgmr.msra.gmra.mxu3 %vm907_vm13, %v2083_v50  ;;  %v2142_v50 = vld [vmem:[%s3185_s4 + $0x20] sm:$0xff] }
 0x388   : > { %2086 = vmatmul.msk.bf16.vlgmr.msrb.gmra.mxu0 %vm907_vm13, %v2085_v57  ;;  %2088 = vmatmul.msk.bf16.vlgmr.msrb.gmra.mxu1 %vm907_vm13, %v2087_v23 }
 0x3d4   : > { %v1229_v24 = vpop.f32.mrf.mxu3 }
 0x3dc   : > { %v1231_v36 = vpop.f32.mrf.mxu3  ;;  %v1300_v26 = vpop.f32.mrf.mxu2 }
 0x3e4   : > { %v1302_v37 = vpop.f32.mrf.mxu2 }
 0x3e5   : > { %v1251_v27 = vpop.f32.mrf.mxu0  ;;  %v1275_v28 = vpop.f32.mrf.mxu1 }
 0x3e6   : > { %v1252_v29 = vadd.f32 %v1251_v27, %v1229_v24 }
 0x3e8   : > { %v1279_v33 = vadd.f32 %v1275_v28, %v1252_v29 }
 0x3ea   : > { %v1304_v38 = vadd.f32 %v1300_v26, %v1279_v33 }
 0x3ec   : > { %v1397_v30 = vpop.f32.mrf.mxu2 }
 0x3ed   : > { %v1253_v31 = vpop.f32.mrf.mxu0  ;;  %v1277_v32 = vpop.f32.mrf.mxu1 }
 0x3f3   : > { %v1325_v35 = vpop.f32.mrf.mxu3 }
 0x3f4   : > { %v1399_v39 = vpop.f32.mrf.mxu2  ;;  %v1329_v43 = vadd.f32 %v1325_v35, %v1304_v38 }
 0x3f5   : > { %v1347_v40 = vpop.f32.mrf.mxu0  ;;  %v1372_v41 = vpop.f32.mrf.mxu1 }
 0x3f6   : > { %v1351_v44 = vadd.f32 %v1347_v40, %v1329_v43 }
 0x3f8   : > { %v1376_v49 = vadd.f32 %v1372_v41, %v1351_v44 }
 0x3fa   : > { %v1401_v51 = vadd.f32 %v1397_v30, %v1376_v49 }
 0x3fb   : > { %v1327_v46 = vpop.f32.mrf.mxu3 }
 0x3fd   : > { %v1349_v47 = vpop.f32.mrf.mxu0  ;;  %v1374_v48 = vpop.f32.mrf.mxu1 }
 0x403   : > { %v1422_v52 = vpop.f32.mrf.mxu3 }
 0x404   : > { %v1426_v11 = vadd.f32 %v1422_v52, %v1401_v51 }
 0x405   : > { %v1447_v53 = vpop.f32.mrf.mxu0  ;;  %v1472_v54 = vpop.f32.mrf.mxu1 }
 0x406   : > { %v1451_v55 = vadd.f32 %v1447_v53, %v1426_v11 }
 0x408   : > { %v1476_v56 = vadd.f32 %v1472_v54, %v1451_v55 }
 0x40a   : > { %v1483_v59 = vadd.f32 %v1481_v58, %v1476_v56 }
 0x40b   : > { %v1424_v60 = vpop.f32.mrf.mxu3 }
 0x40c   : > { %vm1484_vm2 = vcmp.ge.f32.partialorder %v1483_v59, 0.0  ;;  %v1485_v61 = vmul.f32 0.2, %v1483_v59  ;;  %v2122_v60 = vld [vmem:[%s3186_s5 + $0x1] sm:$0x1] }
 0x40d   : > { %v1449_v62 = vpop.f32.mrf.mxu0  ;;  %v1474_v63 = vpop.f32.mrf.mxu1 }
 0x40e   : > { %v1486_v0 = vsel %vm1484_vm2, %v1483_v59, %v1485_v61  ;;  %v2125_v62 = vld [vmem:[%s3186_s5 + $0x2] sm:$0x1] }
 0x40f   : > { %v1488_v1 = vsel %vm893_vm10, %v1486_v0, 0.0  ;;  %1487 = vst [vmem:[%s3150_s7] sm:$0xff] %v1486_v0  ;;  %s1757_s7 = sand.u32 1, %s2562_s10  }
 0x410   : > { %v1489_v10 = vpack.c.bf16 %v1488_v1, %v1488_v1  ;;  %v1680_v1 = vld [vmem:[%s3186_s5] sm:$0x1]  ;;  %s3016_s4 = scalar_lea.sflag [#allocation6], %s1757_s7 }
 0x412   : > { %1623 = vrot.lane.b32.xlu0 %v1489_v10, %s3170_s18  ;;  %1529 = vrot.lane.b32.xlu2 %v1489_v10, %s3181_s21  ;;  %v1564_v3 = vsel %vm911_vm12, %v1489_v10, 0  ;;  %s2032_s21 = sshll.u32 %s2701_s26, 4 }
 0x413   : > { %1501 = vrot.lane.b32.xlu1 %v1489_v10, %s3180_s27  ;;  %1573 = vmatpush.bf16.msra.mxu0 %v1564_v3  ;;  %s2978_s17 = scalar_lea.vmem [#allocation8], %s2032_s21 }
 0x414   : > { %s1826_s0 = sshll.u32 %s2978_s17, 4  ;;  %s1827_s0 = int_to_ptr.vmem [resolvable:$true] %s1826_s0 }
 0x416   : > { %2107 = vmatmul.msk.bf16.vlgmr.msra.gmra.mxu0 %vm907_vm13, %v2140_v13 }
 0x41a   : > { %1657 = vperm.xlu0 %2220, %v1649_v4   ;;  %1652 = vperm.xlu2 %2257, %v1648_v5  }
 0x41b   : > { %1590 = vrot.lane.b32.xlu1 %v1489_v10, %s3169_s16 }
 0x422   : > { %1746 = vperm.xlu0 %2220, %v1743_v6  }
 0x46c   : > { %v1530_v7 = vpop.permute.xlu2 %1529 }
 0x46d   : > { %v1531_v8 = vsel %vm987_vm5, %v2754_v16, %v1530_v7 }
 0x46e   : > { %v1536_v9 = vsel %vm911_vm12, %v1531_v8, 0 }
 0x46f   : > { %1545 = vmatpush.bf16.msrb.mxu3 %v1536_v9 }
 0x472   : > { %2100 = vmatmul.msk.bf16.vlgmr.msrb.gmra.mxu3 %vm907_vm13, %v2138_v12 }
 0x474   : > { %v1653_v35 = vpop.permute.xlu2 %1652 }
 0x484   : > { %v1624_v42 = vpop.permute.xlu0 %1623 }
 0x485   : > { %v1625_v14 = vsel %vm585_vm0, %v1624_v42, %v2804_v45  ;;  %v1502_v16 = vpop.permute.xlu1 %1501 }
 0x486   : > { %v1630_v15 = vsel %vm911_vm12, %v1625_v14, 0  ;;  %v1503_v17 = vsel %vm1015_vm6, %v2783_v34, %v1502_v16 }
 0x487   : > { %v1508_v18 = vsel %vm911_vm12, %v1503_v17, 0 }
 0x488   : > { %1517 = vmatpush.bf16.msrb.mxu2 %v1508_v18 }
 0x48b   : > { %2095 = vmatmul.msk.bf16.vlgmr.msrb.gmra.mxu2 %vm907_vm13, %v2139_v19 }
 0x48c   : > { %1639 = vmatpush.bf16.msra.mxu2 %v1630_v15  ;;  %v1658_v48 = vpop.permute.xlu0 %1657 }
 0x48d   : > { %v1591_v20 = vpop.permute.xlu1 %1590 }
 0x48e   : > { %v1592_v45 = vsel %vm563_vm1, %v1591_v20, %v2766_v25 }
 0x48f   : > { %v1597_v21 = vsel %vm911_vm12, %v1592_v45, 0 }
 0x490   : > { %1606 = vmatpush.bf16.msra.mxu1 %v1597_v21 }
 0x493   : > { %2114 = vmatmul.msk.bf16.vlgmr.msra.gmra.mxu1 %vm907_vm13, %v2141_v22  ;;  %v1575_v24 = vpop.f32.mrf.mxu0 }
 0x49b   : > { %2121 = vmatmul.msk.bf16.vlgmr.msra.gmra.mxu2 %vm907_vm13, %v2142_v50  ;;  %v1577_v31 = vpop.f32.mrf.mxu0 }
 0x4f5   : > { %v1547_v23 = vpop.f32.mrf.mxu3 }
 0x4fd   : > { %v1549_v28 = vpop.f32.mrf.mxu3 }
 0x50e   : > { %v1519_v57 = vpop.f32.mrf.mxu2 }
 0x50f   : > { %v1548_v36 = vadd.f32 %v1547_v23, %v1519_v57 }
 0x510   : > { %v1608_v37 = vpop.f32.mrf.mxu1 }
 0x511   : > { %v1580_v27 = vadd.f32 %v1575_v24, %v1548_v36 }
 0x513   : > { %v1613_v29 = vadd.f32 %v1608_v37, %v1580_v27 }
 0x516   : > { %v1521_v26 = vpop.f32.mrf.mxu2 }
 0x517   : > { %v1550_v30 = vadd.f32 %v1549_v28, %v1521_v26 }
 0x518   : > { %v1610_v40 = vpop.f32.mrf.mxu1 }
 0x519   : > { %v1581_v38 = vadd.f32 %v1577_v31, %v1550_v30 }
 0x51b   : > { %v1614_v43 = vadd.f32 %v1610_v40, %v1581_v38 }
 0x51e   : > { %v1641_v32 = vpop.f32.mrf.mxu2 }
 0x51f   : > { %v1646_v33 = vadd.f32 %v1641_v32, %v1613_v29 }
 0x521   : > { %v1660_v39 = vadd.f32 %v1653_v35, %v1646_v33 }
 0x523   : > { %vm1662_vm0 = vcmp.ge.f32.partialorder %v1660_v39, 0.0  ;;  %v1664_v41 = vmul.f32 0.2, %v1660_v39 }
 0x525   : > { %v1666_v44 = vsel %vm1662_vm0, %v1660_v39, %v1664_v41 }
 0x526   : > { %1668 = vst [vmem:[%s2978_s17] sm:$0xff] %v1666_v44  ;;  %v1643_v46 = vpop.f32.mrf.mxu2  ;;  %v1670_v51 = vsel %vm893_vm10, %v1666_v44, 0.0 }
 0x527   : > { %v1647_v47 = vadd.f32 %v1643_v46, %v1614_v43  ;;  %v1672_v53 = vpack.c.bf16 %v1670_v51, %v1670_v51 }
 0x529   : > { %v1661_v49 = vadd.f32 %v1658_v48, %v1647_v47  ;;  %v1676_v56 = vunpack.c.l.b16 %v1672_v53 }
 0x52b   : > { %vm1663_vm3 = vcmp.ge.f32.partialorder %v1661_v49, 0.0  ;;  %v1665_v52 = vmul.f32 0.2, %v1661_v49 }
 0x52d   : > { %v1667_v11 = vsel %vm1663_vm3, %v1661_v49, %v1665_v52 }
 0x52e   : > { %1669 = vst [vmem:[%s2978_s17 + $0x8] sm:$0xff] %v1667_v11  ;;  %v1671_v54 = vsel %vm893_vm10, %v1667_v11, 0.0 }
 0x52f   : > { %v1673_v55 = vpack.c.bf16 %v1671_v54, %v1671_v54 }
 0x531   : > { %v1677_v58 = vunpack.c.l.b16 %v1673_v55 }
 0x533   : > { %v1678_v59 = vpack.c.b16 %v1677_v58, %v1676_v56 }
 0x535   : > { %1722 = vrot.lane.b32.xlu2 %v1678_v59, %s3169_s16  ;;  %1700 = vrot.lane.b32.xlu1 %v1678_v59, %s3180_s27  ;;  %s1825_s16 = scalar_lea.hbm %s3125_s14, %s2143_s28  ;;  %s1800_s27 = sshll.u32 %s1796_s1, 4  ;;  %s1801_s27 = int_to_ptr.hbm [resolvable:$true] %s1800_s27 }
 0x536   : > { %1694 = vmatpush.bf16.msra.mxu3 %v1678_v59  ;;  %s2272_s5 = sshra.s32 %s1801_s27, 4  ;;  %s2278_s28 = scalar_lea.hbm %s3187_s12, 16  ;;  %s2273_s5 = int_to_ptr.hbm [resolvable:$true] %s2272_s5 }
 0x537   : > { %s2274_s8 = scalar_lea.hbm %s2273_s5, 8  ;;  %p2279_p0 = scmp.lt.s32.totalorder %s2273_s5, %s3187_s12 }
 0x538   : > { %p2275_p11 = scmp.ne.s32.totalorder %s2273_s5, %s2274_s8  ;;  %p2280_p1 = scmp.lt.s32.totalorder %s2278_s28, %s2274_s8 }
 0x539   : > { %2123 = vmatmul.msk.bf16.vlgmr.msra.gmra.mxu3 %vm1683_vm4, %v2122_v60 }
 0x53a   : > { %p2276_p12 = pnand %p2275_p11, %p2581_p5  ;;  %p2281_p2 = por %p2280_p1, %p2279_p0 }
 0x53c   : > { %p2277_p13 = pneg %p2276_p12 }
 0x53e   : > { %p2282_p3 = pnand %p2281_p2, %p2277_p13 }
 0x58f   : > { %v1723_v2 = vpop.permute.xlu2 %1722 }
 0x590   : > { %v1724_v61 = vsel %vm563_vm1, %v1723_v2, %v2766_v25 }
 0x591   : > { %1736 = vmatpush.bf16.msrb.mxu1 %v1724_v61 }
 0x594   : > { %2126 = vmatmul.msk.bf16.vlgmr.msrb.gmra.mxu1 %vm1683_vm4, %v2125_v62 }
 0x5a7   : > { %v1701_v63 = vpop.permute.xlu1 %1700 }
 0x5a8   : > { %v1702_v0 = vsel %vm1015_vm6, %v2783_v34, %v1701_v63 }
 0x5a9   : > { %1714 = vmatpush.bf16.msrb.mxu0 %v1702_v0 }
 0x5ac   : > { %2124 = vmatmul.msk.bf16.vlgmr.msrb.gmra.mxu0 %vm1683_vm4, %v1680_v1 }
 0x5ad   : > { %2285 = shalt.err (!%p2282_p3)
}
 0x5ae   : > { %2146 = dma.vmem_to_hbm [thread:$0]  (%p2581_p5), %s1799_s3, 128, %s1801_s27, %s3016_s4  }
 0x5af   : > { %s1828_s2 = sshll.u32 %s1825_s16, 4  ;;  %s3029_s17 = scalar_lea.sflag [#allocation9], %s1757_s7  ;;  %s1829_s2 = int_to_ptr.hbm [resolvable:$true] %s1828_s2 }
 0x5b0   : > { %s2300_s1 = sshra.s32 %s1829_s2, 4  ;;  %s2306_s21 = scalar_lea.hbm %s3125_s14, 32  ;;  %s2301_s1 = int_to_ptr.hbm [resolvable:$true] %s2300_s1 }
 0x5b1   : > { %s2302_s18 = scalar_lea.hbm %s2301_s1, 16  ;;  %p2307_p9 = scmp.lt.s32.totalorder %s2301_s1, %s3125_s14 }
 0x5b2   : > { %p2303_p4 = scmp.ne.s32.totalorder %s2301_s1, %s2302_s18  ;;  %p2308_p10 = scmp.lt.s32.totalorder %s2306_s21, %s2302_s18 }
 0x5b4   : > { %p2304_p7 = pnand %p2303_p4, %p2581_p5  ;;  %p2309_p11 = por %p2308_p10, %p2307_p9 }
 0x5b6   : > { %p2305_p8 = pneg %p2304_p7 }
 0x5b8   : > { %p2310_p12 = pnand %p2309_p11, %p2305_p8 }
 0x5ba   : > { %2313 = shalt.err (!%p2310_p12)
}
 0x5bb   : > { %s2456_s3 = smov 128   ;;  %s2457_s7 = smov 8  }
 0x5bc   : > { %2148 = dma.vmem_to_hbm [thread:$0]  (%p2581_p5), %s1827_s0, 256, %s1829_s2, %s3029_s17, %s2456_s3, %s2456_s3, %s2457_s7  }
 0x5bd   : > { %s1782_s22 = scalar_lea.hbm %s3122_s11, %s3002_s6  ;;  %s3189_s1 = scalar_lea.vmem [#allocation3], %s2706_s19 }
 0x5be   : > { %s1784_s18 = sshll.u32 %s3189_s1, 4  ;;  %s1786_s5 = sshll.u32 %s1782_s22, 4  ;;  %s1785_s18 = int_to_ptr.vmem [resolvable:$true] %s1784_s18  ;;  %s1787_s5 = int_to_ptr.hbm [resolvable:$true] %s1786_s5 }
 0x5bf   : > { %s1810_s28 = scalar_lea.hbm %s3124_s13, %s3002_s6  ;;  %s1753_s24 = scalar_lea.sflag [#allocation4], %s2701_s26 }
 0x5c0   : > { %s2328_s9 = sshra.s32 %s1787_s5, 4  ;;  %s2334_s3 = scalar_lea.hbm %s3122_s11, 16  ;;  %s2329_s9 = int_to_ptr.hbm [resolvable:$true] %s2328_s9 }
 0x5c1   : > { %s2330_s12 = scalar_lea.hbm %s2329_s9, 8  ;;  %p2335_p2 = scmp.lt.s32.totalorder %s2329_s9, %s3122_s11 }
 0x5c2   : > { %p2331_p13 = scmp.ne.s32.totalorder %s2329_s9, %s2330_s12  ;;  %p2336_p3 = scmp.lt.s32.totalorder %s2334_s3, %s2330_s12 }
 0x5c4   : > { %p2332_p0 = pnand %p2331_p13, %p2581_p5  ;;  %p2337_p4 = por %p2336_p3, %p2335_p2 }
 0x5c6   : > { %p2333_p1 = pneg %p2332_p0 }
 0x5c8   : > { %p2338_p7 = pnand %p2337_p4, %p2333_p1 }
 0x5ca   : > { %2341 = shalt.err (!%p2338_p7)
}
 0x5cb   : > { %2145 = dma.vmem_to_hbm [thread:$0]  (%p2581_p5), %s1785_s18, 128, %s1787_s5, %s1753_s24  }
 0x5cc   : > { %s3190_s6 = scalar_lea.vmem [#allocation7], %s2706_s19  ;;  %s1814_s22 = sshll.u32 %s1810_s28, 4  ;;  %s1815_s22 = int_to_ptr.hbm [resolvable:$true] %s1814_s22 }
 0x5cd   : > { %s1812_s27 = sshll.u32 %s3190_s6, 4  ;;  %s2356_s1 = sshra.s32 %s1815_s22, 4  ;;  %s1813_s27 = int_to_ptr.vmem [resolvable:$true] %s1812_s27  ;;  %s2357_s1 = int_to_ptr.hbm [resolvable:$true] %s2356_s1 }
 0x5ce   : > { %s2358_s8 = scalar_lea.hbm %s2357_s1, 8  ;;  %s2362_s21 = scalar_lea.hbm %s3124_s13, 16 }
 0x5cf   : > { %p2359_p8 = scmp.ne.s32.totalorder %s2357_s1, %s2358_s8  ;;  %p2363_p11 = scmp.lt.s32.totalorder %s2357_s1, %s3124_s13 }
 0x5d0   : > { %p2364_p12 = scmp.lt.s32.totalorder %s2362_s21, %s2358_s8 }
 0x5d1   : > { %p2360_p9 = pnand %p2359_p8, %p2581_p5 }
 0x5d2   : > { %p2365_p13 = por %p2364_p12, %p2363_p11 }
 0x5d3   : > { %p2361_p10 = pneg %p2360_p9 }
 0x5d5   : > { %p2366_p0 = pnand %p2365_p13, %p2361_p10 }
 0x5d7   : > { %2369 = shalt.err (!%p2366_p0)
}
 0x5d8   : > { %2147 = dma.vmem_to_hbm [thread:$0]  (%p2581_p5), %s1813_s27, 128, %s1815_s22, %s3016_s4   ;;  %v1696_v25 = vpop.f32.mrf.mxu3  ;;  %v1747_v4 = vpop.permute.xlu0 %1746 }
 0x5d9   : > { %s1840_s5 = scalar_lea.hbm %s3126_s15, %s2562_s10  ;;  %s521_s28 = scalar_lea.vmem [#allocation10], %s2701_s26  ;;  %v1749_v7 = vperm.slane %v1747_v4, 0 }
 0x5da   : > { %s1842_s24 = sshll.u32 %s521_s28, 4  ;;  %s1844_s3 = sshll.u32 %s1840_s5, 4  ;;  %s1843_s24 = int_to_ptr.vmem [resolvable:$true] %s1842_s24  ;;  %s1845_s3 = int_to_ptr.hbm [resolvable:$true] %s1844_s3 }
 0x5db   : > { %s2384_s4 = sshra.s32 %s1845_s3, 4  ;;  %s2390_s26 = scalar_lea.hbm %s3126_s15, 2  ;;  %s2385_s4 = int_to_ptr.hbm [resolvable:$true] %s2384_s4 }
 0x5dc   : > { %s2386_s7 = scalar_lea.hbm %s2385_s4, 1  ;;  %p2391_p4 = scmp.lt.s32.totalorder %s2385_s4, %s3126_s15 }
 0x5dd   : > { %p2387_p1 = scmp.ne.s32.totalorder %s2385_s4, %s2386_s7  ;;  %p2392_p7 = scmp.lt.s32.totalorder %s2390_s26, %s2386_s7 }
 0x5df   : > { %p2388_p2 = pnand %p2387_p1, %p2581_p5  ;;  %p2393_p8 = por %p2392_p7, %p2391_p4 }
 0x5e0   : > { %v1698_v34 = vpop.f32.mrf.mxu3 }
 0x5e1   : > { %p2389_p3 = pneg %p2388_p2 }
 0x5e3   : > { %p2394_p9 = pnand %p2393_p8, %p2389_p3 }
 0x611   : > { %v1738_v10 = vpop.f32.mrf.mxu1 }
 0x619   : > { %v1740_v3 = vpop.f32.mrf.mxu1 }
 0x629   : > { %v1716_v5 = vpop.f32.mrf.mxu0 }
 0x62a   : > { %v1717_v6 = vadd.f32 %v1716_v5, %v1696_v25 }
 0x62c   : > { %v1742_v8 = vadd.f32 %v1738_v10, %v1717_v6 }
 0x62e   : > { %v1750_v9 = vadd.f32 %v1749_v7, %v1742_v8 }
 0x630   : > { %1751 = vst [vmem:[%s521_s28] sm:$0x1] %v1750_v9 }
 0x631   : > { %v1718_v12 = vpop.f32.mrf.mxu0 }
 0x632   : > { %2397 = shalt.err (!%p2394_p9)
}
 0x633   : > { %2149 = dma.vmem_to_hbm [thread:$0]  (%p2581_p5), %s1843_s24, 16, %s1845_s3, %s3029_s17  }
 0x634 PF: > { %p2171_p10 = scmp.ge.s32.totalorder %s2440_s23, 2  ;;  %s1856_s22 = sand.u32 1, %s2428_s20  }
 0x635   : > { %s1857_s1 = scalar_lea.sflag [#allocation4], %s1856_s22 }
 0x636   : > { %p2156_p11 = pnand %p2171_p10, %p2585_p6 }
 0x638   : > { %p2157_p12 = pneg %p2156_p11 }
 0x63a   : > { %2415 = dma.done.wait (%p2157_p12), %s1857_s1, 128  }
 0x63b   : > { %2417 = vsyncadd (%p2157_p12), %s1857_s1, 4294967168  ;;  %s3191_s8 = sadd.s32 4294967294, %s2440_s23  }
 0x63c   : > { %s1866_s9 = sand.u32 1, %s3191_s8  }
 0x63d   : > { %s1867_s12 = scalar_lea.sflag [#allocation6], %s1866_s9 }
 0x63e   : > { %2419 = dma.done.wait (%p2157_p12), %s1867_s12, 256  }
 0x63f   : > { %2421 = vsyncadd (%p2157_p12), %s1867_s12, 4294967040  ;;  %s1887_s29 = scalar_lea.sflag [#allocation9], %s1866_s9 }
 0x640   : > { %2423 = dma.done.wait (%p2157_p12), %s1887_s29, 272  }
 0x641   : > { %2425 = vsyncadd (%p2157_p12), %s1887_s29, 4294967024  ;;  %s3192_s20 = sld [smem:[#allocation14_spill]]  ;;  %p34_p5 = scmp.ge.s32.totalorder %s2566_s25, 4  }
 0x642   : > { %s3193_s21 = sld [smem:[#allocation15_spill]]  ;;  %s3195_s23 = smov %s2566_s25 }
 0x643   : > { %s3194_s22 = sld [smem:[#allocation16_spill]]  ;;  %36 = sbr.rel (!%p34_p5) target bundleno = 19 (0x13), region = 203 }
 0x648   :  { %1902 = vsyncpa [#allocation4], 1 }
 0x649   :  { %1904 = vsyncpa [#allocation4 + $0x1], 1 }
 0x64a   :  { %1905 = vsyncpa [#allocation6], 1 }
 0x64b   :  { %1907 = vsyncpa [#allocation6 + $0x1], 1 }
 0x64c   :  { %1908 = vsyncpa [#allocation9], 1 }
 0x64d   :  { %1910 = vsyncpa [#allocation9 + $0x1], 1 }

</bundles_post_ra>
